<compile_context>
chip_gen: v6e
topology: v6e:2x2x1
jax: 0.10.0
libtpu: 0.0.40
codegen_flags: <defaults>
</compile_context>

<pallas_src>
import functools

import jax
import jax.numpy as jnp
from jax.experimental import pallas as pl
from jax.experimental.pallas import tpu as pltpu


def _dynamic_estimator_kernel(x_ref, mean_ref, rho_ref, o_ref, *, matmul_dtype):
    x = x_ref[...].astype(jnp.float32)        # (B, D)
    m = mean_ref[...].astype(jnp.float32)     # (TC, D)
    rho = rho_ref[...].astype(jnp.float32)    # (TC, D)

    # Numerically-stable softplus: softplus(r) = max(r, 0) + log1p(exp(-|r|)).
    sigma = jnp.maximum(rho, 0.0) + jnp.log1p(jnp.exp(-jnp.abs(rho)))
    w = 1.0 / (2.0 * sigma * sigma)           # (TC, D)

    # sum_d (x - m)^2 * w  expanded onto the MXU.  "NT" dot_general: contract
    # dim 1 of both operands, so w / (m*w) stay in (TC, D) layout (no vxpose).
    dn = (((1,), (1,)), ((), ()))
    t1 = jax.lax.dot_general((x * x).astype(matmul_dtype), w.astype(matmul_dtype),
                             dn, preferred_element_type=jnp.float32)   # (B, TC)
    t2 = jax.lax.dot_general(x.astype(matmul_dtype), (m * w).astype(matmul_dtype),
                             dn, preferred_element_type=jnp.float32)   # (B, TC)
    t3 = jnp.sum(m * m * w, axis=-1)[None, :]                          # (1, TC)
    est = t1 - 2.0 * t2 + t3                                           # (B, TC)

    o_ref[...] = jnp.exp(-est)


def _pick_tile_c(C, D, B, vmem_tile_budget=24 << 20):
    """Largest 256-multiple class tile that fits VMEM and keeps >= 2 grid steps."""
    def fits(t):
        # means + rhos tiles (double buffered, f32 worst case) + output tile.
        return (2 * 2 * t * D * 4 + 2 * B * t * 4) <= vmem_tile_budget

    for t in (2048, 1024, 512, 256):      # 256-multiples fill v6e/v7x MXU
        if C % t == 0 and C // t >= 2 and fits(t):
            return t
    if C % 128 == 0 and C // 128 >= 2 and fits(128):
        return 128
    return C                              # single full-extent block fallback


def dynamic_estimator_forward(x, means, rhos, *, tile_c=None,
                              matmul_dtype=jnp.float32):
    """x: [B, D]; means/rhos: [C, D] (f32 or bf16) -> [B, C] float32."""
    B, D = x.shape
    C, D2 = means.shape
    assert D == D2 and rhos.shape == (C, D)

    if tile_c is None:
        tile_c = _pick_tile_c(C, D, B)
    assert C % tile_c == 0, "out_features must be divisible by tile_c"
    grid = (C // tile_c,)

    # Explicit scoped-VMEM budget: double-buffered in/out tiles + margin,
    # capped so it also fits comfortably in v7x's 64 MiB per-core VMEM.
    in_bytes = means.dtype.itemsize
    tile_bytes = (2 * 2 * tile_c * D * in_bytes      # means + rhos tiles
                  + 2 * B * D * x.dtype.itemsize     # x block
                  + 2 * B * tile_c * 4)              # output tile
    vmem_limit = int(min(max(4 * tile_bytes, 16 << 20), 48 << 20))

    kernel = functools.partial(_dynamic_estimator_kernel,
                               matmul_dtype=matmul_dtype)

    return pl.pallas_call(
        kernel,
        out_shape=jax.ShapeDtypeStruct((B, C), jnp.float32),
        grid_spec=pltpu.PrefetchScalarGridSpec(
            num_scalar_prefetch=0,
            grid=grid,
            in_specs=[
                pl.BlockSpec((B, D), lambda j: (0, 0)),        # x (full, reused)
                pl.BlockSpec((tile_c, D), lambda j: (j, 0)),   # means tile
                pl.BlockSpec((tile_c, D), lambda j: (j, 0)),   # rhos tile
            ],
            out_specs=pl.BlockSpec((B, tile_c), lambda j: (0, j)),
        ),
        compiler_params=pltpu.CompilerParams(
            dimension_semantics=("parallel",),   # class tiles shard across TCs
            vmem_limit_bytes=vmem_limit,
        ),
    )(x, means, rhos)


if __name__ == "__main__":
    # Small shapes consistent with the module: in_features=D, out_features=C.
    B = 8        # batch
    D = 32       # in_features
    C = 512      # out_features -> tile_c=256, grid=(2,)

    key = jax.random.PRNGKey(0)
    kx, km, kr = jax.random.split(key, 3)

    x = jax.random.normal(kx, (B, D), dtype=jnp.float32)
    # torch.rand -> uniform [0, 1); deterministic synthetic params.
    means = jax.random.uniform(km, (C, D), dtype=jnp.float32)
    rhos = jax.random.uniform(kr, (C, D), dtype=jnp.float32)

    out = jax.block_until_ready(dynamic_estimator_forward(x, means, rhos))

    # Pure-JAX reference (direct broadcast form of the PyTorch math).
    sigma = jnp.log1p(jnp.exp(rhos))                      # (C, D)
    w = 1.0 / (2.0 * sigma * sigma)                       # (C, D)
    est = jnp.sum(((x[:, None, :] - means[None]) ** 2) * w[None], axis=-1)
    ref = jnp.exp(-est)                                   # (B, C)

    assert out.shape == (B, C)
    assert jnp.allclose(out, ref, rtol=1e-4, atol=1e-5), (
        float(jnp.max(jnp.abs(out - ref))))

    # Reduced-precision lever for v6e/v7x (bf16-stored params + bf16 MXU
    # operands, f32 accumulation): run once to confirm it compiles/executes.
    out_lp = jax.block_until_ready(
        dynamic_estimator_forward(x, means.astype(jnp.bfloat16),
                                  rhos.astype(jnp.bfloat16),
                                  matmul_dtype=jnp.bfloat16))
    assert out_lp.shape == (B, C)
    assert bool(jnp.all(jnp.isfinite(out_lp))) and bool(jnp.all(out_lp >= 0.0))

    print("KERNEL_OK")
</pallas_src>

<mosaic_0001>
module attributes {stable_mosaic.version = 11 : i64} {
  func.func @_dynamic_estimator_kernel(%arg0: i32, %arg1: memref<8x32xf32, #tpu.memory_space<vmem>>, %arg2: memref<256x32xf32, #tpu.memory_space<vmem>>, %arg3: memref<256x32xf32, #tpu.memory_space<vmem>>, %arg4: memref<8x256xf32, #tpu.memory_space<vmem>>) attributes {dimension_semantics = [#tpu.dimension_semantics<parallel>], iteration_bounds = array<i64: 2>, scalar_prefetch = 0 : i64, scratch_operands = 0 : i64, tpu.core_type = #tpu.core_type<tc>, window_params = [{pipeline_mode = #tpu.pipeline_mode<synchronous>, transform_indices = @transform_0, window_bounds = array<i64: 8, 32>}, {transform_indices = @transform_1, window_bounds = array<i64: 256, 32>}, {transform_indices = @transform_2, window_bounds = array<i64: 256, 32>}, {transform_indices = @transform_3, window_bounds = array<i64: 8, 256>}]} {
    %c0 = arith.constant 0 : index
    %c0_0 = arith.constant 0 : index
    %0 = vector.load %arg1[%c0, %c0_0] : memref<8x32xf32, #tpu.memory_space<vmem>>, vector<8x32xf32>
    %c0_1 = arith.constant 0 : index
    %c0_2 = arith.constant 0 : index
    %1 = vector.load %arg2[%c0_1, %c0_2] : memref<256x32xf32, #tpu.memory_space<vmem>>, vector<256x32xf32>
    %c0_3 = arith.constant 0 : index
    %c0_4 = arith.constant 0 : index
    %2 = vector.load %arg3[%c0_3, %c0_4] : memref<256x32xf32, #tpu.memory_space<vmem>>, vector<256x32xf32>
    %cst = arith.constant 0.000000e+00 : f32
    %3 = vector.broadcast %cst : f32 to vector<256x32xf32>
    %4 = arith.maximumf %2, %3 : vector<256x32xf32>
    %5 = math.absf %2 : vector<256x32xf32>
    %cst_5 = arith.constant 0.000000e+00 : f32
    %6 = vector.broadcast %cst_5 : f32 to vector<256x32xf32>
    %7 = arith.subf %6, %5 : vector<256x32xf32>
    %8 = math.exp %7 : vector<256x32xf32>
    %9 = math.log1p %8 : vector<256x32xf32>
    %10 = arith.addf %4, %9 : vector<256x32xf32>
    %cst_6 = arith.constant 2.000000e+00 : f32
    %11 = vector.broadcast %cst_6 : f32 to vector<256x32xf32>
    %12 = arith.mulf %11, %10 : vector<256x32xf32>
    %13 = arith.mulf %12, %10 : vector<256x32xf32>
    %cst_7 = arith.constant 1.000000e+00 : f32
    %14 = vector.broadcast %cst_7 : f32 to vector<256x32xf32>
    %15 = arith.divf %14, %13 : vector<256x32xf32>
    %16 = arith.mulf %0, %0 : vector<8x32xf32>
    %cst_8 = arith.constant dense<0.000000e+00> : vector<8x256xf32>
    %17 = tpu.matmul %16, %15, %cst_8 {dimension_numbers = #tpu.dot_dimension_numbers<[1], [1], [0], [0], [0, 0, 1, 0], [], []>} : vector<8x32xf32>, vector<256x32xf32>, vector<8x256xf32> -> vector<8x256xf32>
    %18 = arith.mulf %1, %15 : vector<256x32xf32>
    %cst_9 = arith.constant dense<0.000000e+00> : vector<8x256xf32>
    %19 = tpu.matmul %0, %18, %cst_9 {dimension_numbers = #tpu.dot_dimension_numbers<[1], [1], [0], [0], [0, 0, 1, 0], [], []>} : vector<8x32xf32>, vector<256x32xf32>, vector<8x256xf32> -> vector<8x256xf32>
    %20 = arith.mulf %1, %1 : vector<256x32xf32>
    %21 = arith.mulf %20, %15 : vector<256x32xf32>
    %cst_10 = arith.constant dense<0.000000e+00> : vector<256xf32>
    %22 = vector.multi_reduction <add>, %21, %cst_10 [1] : vector<256x32xf32> to vector<256xf32>
    %23 = vector.shape_cast %22 : vector<256xf32> to vector<1x256xf32>
    %cst_11 = arith.constant 2.000000e+00 : f32
    %24 = vector.broadcast %cst_11 : f32 to vector<8x256xf32>
    %25 = arith.mulf %24, %19 : vector<8x256xf32>
    %26 = arith.subf %17, %25 : vector<8x256xf32>
    %27 = vector.broadcast %23 : vector<1x256xf32> to vector<8x256xf32>
    %28 = arith.addf %26, %27 : vector<8x256xf32>
    %cst_12 = arith.constant 0.000000e+00 : f32
    %29 = vector.broadcast %cst_12 : f32 to vector<8x256xf32>
    %30 = arith.subf %29, %28 : vector<8x256xf32>
    %31 = math.exp %30 : vector<8x256xf32>
    %c0_13 = arith.constant 0 : index
    %c0_14 = arith.constant 0 : index
    %32 = vector.load %arg4[%c0_13, %c0_14] : memref<8x256xf32, #tpu.memory_space<vmem>>, vector<8x256xf32>
    tpu.vector_store %arg4[%c0_13, %c0_14], %31 {strides = array<i32>} : memref<8x256xf32, #tpu.memory_space<vmem>>, vector<8x256xf32>,
    return
  }
  func.func @transform_0(%arg0: i32) -> (i32, i32) {
    %c0_i32 = arith.constant 0 : i32
    %c0_i32_0 = arith.constant 0 : i32
    %c0_i32_1 = arith.constant 0 : i32
    return %c0_i32, %c0_i32_0 : i32, i32
  }
  func.func @transform_1(%arg0: i32) -> (i32, i32) {
    %c0_i32 = arith.constant 0 : i32
    %c0_i32_0 = arith.constant 0 : i32
    return %arg0, %c0_i32 : i32, i32
  }
  func.func @transform_2(%arg0: i32) -> (i32, i32) {
    %c0_i32 = arith.constant 0 : i32
    %c0_i32_0 = arith.constant 0 : i32
    return %arg0, %c0_i32 : i32, i32
  }
  func.func @transform_3(%arg0: i32) -> (i32, i32) {
    %c0_i32 = arith.constant 0 : i32
    %c0_i32_0 = arith.constant 0 : i32
    return %c0_i32, %arg0 : i32, i32
  }
}

</mosaic_0001>

<bundles_post_ra>
// kernel: tpu_custom_call.1
= control target key start
LH: loop header
LB: loop body
LE: loop exit
PB: predicated region body
PF: predicated region fallthrough
CT: control target
= control target key end

     0   :  { %8 = vsyncpa [#allocation3], 0  ;;  %s3263_s0 = inlined_call_operand.vmem [shape: f32[8,32], index: 0, kind: input, shape index: {}]   ;;  %s3264_s1 = inlined_call_operand.vmem [shape: f32[512,32], index: 1, kind: input, shape index: {}]   ;;  %s3265_s2 = inlined_call_operand.vmem [shape: f32[512,32], index: 2, kind: input, shape index: {}]   ;;  %s3266_s3 = inlined_call_operand.hbm [shape: f32[8,512], index: 3, kind: output, shape index: {}]  }
   0x1   :  { %10 = vsyncpa [#allocation3 + $0x1], 0  ;;  %s2223_s12 = smov 0   ;;  %s2225_s13 = smov 0  }
   0x2   :  { %s2227_s14 = smov 0   ;;  %s2229_s15 = smov 0  }
   0x3 LB: > { %s2244_s16 = sadd.s32 4294967295, %s2200_s15   ;;  %s1743_s17 = sadd.s32 4294967294, %s2200_s15   ;;  %s2200_s15 = sphi %s2229_s15, %s3332_s15   ;;  %s2196_s14 = sphi %s2227_s14, %s3331_s14   ;;  %s2192_s13 = sphi %s2225_s13, %s3330_s13   ;;  %s2188_s12 = sphi %s2223_s12, %s3329_s12  }
   0x4   : > { %s2248_s18 = sadd.s32 1, %s2200_s15   ;;  %s96_s19 = sadd.s32 1, %s2196_s14 }
   0x5   : > { %s93_s20 = ssub.s32 %s2200_s15, %s2248_s18  ;;  %p106_p0 = scmp.ne.s32.totalorder %s2196_s14, %s2192_s13 }
   0x6   : > { %p94_p1 = scmp.eq.s32.totalorder %s93_s20, 0  ;;  %p107_p2 = scmp.eq.s32.totalorder %s2244_s16, 1 }
   0x7   : > { %p112_p3 = scmp.ne.s32.totalorder %s2192_s13, %s2188_s12  ;;  %p113_p4 = scmp.eq.s32.totalorder %s1743_s17, 1 }
   0x8   : > { %s2259_s21 = scalar_select %p94_p1, %s2196_s14, %s96_s19  }
   0x9   : > { %p2261_p5 = por %p107_p2, %p106_p0  ;;  %p2265_p6 = por %p113_p4, %p112_p3 }
   0xa   : > { %p1746_p7 = scmp.ge.s32.totalorder %s2200_s15, 1  ;;  %p152_p8 = scmp.lt.s32.totalorder %s2200_s15, 3 }
   0xc   : > { %p153_p9 = pnand %p1746_p7, %p152_p8 }
   0xd   : > { %s1748_s24 = sshll.u32 (!%p153_p9), %s2244_s16, 5  ;;  %s178_s7 = sand.u32 (!%p153_p9), 1, %s2192_s13  }
   0xe   : > { %156 = sbr.rel (%p153_p9) target bundleno = 481 (0x1e1), region = 32  ;;  %p182_p10 = scmp.lt.s32.totalorder (!%p153_p9), %s1748_s24, 63 }
   0xf   : > { %s1747_s8 = sshll.u32 (!%p153_p9), %s178_s7, 4  ;;  %s1823_s9 = sshll.u32 (!%p153_p9), %s2244_s16, 8 }
  0x10   : > { %s180_s10 = scalar_lea.vmem (!%p153_p9), [#allocation2], %s1747_s8  ;;  %s3228_s20 = scalar_lea.hbm (!%p153_p9), %s3266_s3, %s1823_s9 }
  0x11   : > { %s1672_s11 = sshll.u32 (!%p153_p9), %s180_s10, 4  ;;  %s2202_s26 = smov (!%p153_p9), [#allocation2]   ;;  %s1673_s11 = int_to_ptr.vmem [resolvable:$true] %s1672_s11 }
  0x12   : > { %s2144_s16 = sshll.u32 (!%p153_p9), %s2202_s26, 4  ;;  %s2145_s16 = int_to_ptr.vmem [resolvable:$false] %s2144_s16 }
  0x13   : > { %s3334_s24 = smov (!%p182_p10, %s1748_s24), 63  ;;  %vm868_vm10 = vcmask 261120   ;;  %s2146_s27 = scalar_lea.vmem %s2145_s16, 512 }
  0x14   : > { %s1749_s25 = sshll.u32 %s3334_s24, 3  ;;  %s1658_s24 = scalar_lea.sflag [#allocation3], %s178_s7 }
  0x15   : > { %s2280_s28 = scalar_lea.vmem %s3265_s2, %s1749_s25  ;;  %s2455_s4 = scalar_lea.vmem %s3264_s1, %s1749_s25 }
  0x16   : > { %v2283_v0 = vld [vmem:[%s2280_s28 + $0xf8] sm:$0xff]  ;;  %v2290_v3 = vld [vmem:[%s2280_s28 + $0xf0] sm:$0xff]  ;;  %v2298_v8 = vld [vmem:[%s2280_s28 + $0xe8] sm:$0xff]  ;;  %s2140_s25 = scalar_lea.vmem %s1673_s11, 256  ;;  %p2147_p0 = scmp.lt.s32.totalorder %s1673_s11, %s2145_s16 }
  0x17   : > { %v2286_v1 = vld [vmem:[%s2280_s28 + $0x78] sm:$0xff]  ;;  %v322_v2 = vand.u32 2147483647, %v2283_v0  ;;  %v321_v5 = vand.u32 2147483647, %v2290_v3  ;;  %v2295_v7 = vld [vmem:[%s2280_s28 + $0x70] sm:$0xff]  ;;  %p2141_p11 = scmp.ne.s32.totalorder %s1673_s11, %s2140_s25  ;;  %p2148_p1 = scmp.lt.s32.totalorder %s2146_s27, %s2140_s25 }
  0x18   : > { %v306_v4 = vand.u32 2147483647, %v2286_v1  ;;  %v305_v11 = vand.u32 2147483647, %v2295_v7  ;;  %v320_v13 = vand.u32 2147483647, %v2298_v8 }
  0x19   : > { %v354_v6 = vsub.f32 0.0, %v322_v2  ;;  %v353_v10 = vsub.f32 0.0, %v321_v5  ;;  %v2303_v14 = vld [vmem:[%s2280_s28 + $0x68] sm:$0xff]  ;;  %v2307_v20 = vld [vmem:[%s2280_s28 + $0xe0] sm:$0xff]  ;;  %v2314_v26 = vld [vmem:[%s2280_s28 + $0xd8] sm:$0xff]  ;;  %v290_v45 = vmax.f32 %v2283_v0, 0.0  ;;  %p2142_p12 = pnand %p2141_p11, %p2261_p5  ;;  %p2149_p2 = por %p2148_p1, %p2147_p0 }
  0x1a   : > { %v338_v9 = vsub.f32 0.0, %v306_v4  ;;  %v337_v17 = vsub.f32 0.0, %v305_v11  ;;  %v352_v18 = vsub.f32 0.0, %v320_v13  ;;  %v304_v19 = vand.u32 2147483647, %v2303_v14  ;;  %v2311_v23 = vld [vmem:[%s2280_s28 + $0x60] sm:$0xff] }
  0x1b   : > { %v417_v12 = vmul.f32 1.442695, %v354_v6  ;;  %v415_v16 = vmul.f32 1.442695, %v353_v10  ;;  %v319_v22 = vand.u32 2147483647, %v2307_v20  ;;  %p2143_p13 = pneg %p2142_p12 }
  0x1c   : > { %v385_v15 = vmul.f32 1.442695, %v338_v9  ;;  %v383_v21 = vmul.f32 1.442695, %v337_v17  ;;  %v413_v24 = vmul.f32 1.442695, %v352_v18 }
  0x1d   : > { %1931 = vpow2.f32 %v417_v12  ;;  %v336_v25 = vsub.f32 0.0, %v304_v19  ;;  %v351_v27 = vsub.f32 0.0, %v319_v22  ;;  %v303_v28 = vand.u32 2147483647, %v2311_v23  ;;  %v2318_v29 = vld [vmem:[%s2280_s28 + $0x80] sm:$0xff]  ;;  %v2326_v37 = vld [vmem:[%s2280_s28 + $0x58] sm:$0xff]  ;;  %p2150_p3 = pnand %p2149_p2, %p2143_p13 }
  0x1e   : > { %1933 = vpow2.f32 %v385_v15  ;;  %v318_v31 = vand.u32 2147483647, %v2314_v26  ;;  %v307_v34 = vand.u32 2147483647, %v2318_v29  ;;  %v2323_v36 = vld [vmem:[%s2280_s28] sm:$0xff]  ;;  %v2330_v42 = vld [vmem:[%s2280_s28 + $0xd0] sm:$0xff] }
  0x1f   : > { %1935 = vpow2.f32 %v415_v16  ;;  %v381_v30 = vmul.f32 1.442695, %v336_v25  ;;  %v411_v32 = vmul.f32 1.442695, %v351_v27  ;;  %v335_v33 = vsub.f32 0.0, %v303_v28  ;;  %v2346_v9 = vld [vmem:[%s2280_s28 + $0x88] sm:$0xff] }
  0x20   : > { %1937 = vpow2.f32 %v383_v21  ;;  %v350_v35 = vsub.f32 0.0, %v318_v31  ;;  %v339_v39 = vsub.f32 0.0, %v307_v34  ;;  %v291_v41 = vand.u32 2147483647, %v2323_v36  ;;  %v2350_v19 = vld [vmem:[%s2280_s28 + $0x8] sm:$0xff] }
  0x21   : > { %1939 = vpow2.f32 %v413_v24  ;;  %v379_v38 = vmul.f32 1.442695, %v335_v33  ;;  %v302_v44 = vand.u32 2147483647, %v2326_v37  ;;  %v274_v46 = vmax.f32 %v2286_v1, 0.0 }
  0x22   : > { %1941 = vpow2.f32 %v381_v30  ;;  %v409_v40 = vmul.f32 1.442695, %v350_v35  ;;  %v387_v43 = vmul.f32 1.442695, %v339_v39  ;;  %v323_v47 = vsub.f32 0.0, %v291_v41 }
  0x23   : > { %1943 = vpow2.f32 %v411_v32  ;;  %v289_v48 = vmax.f32 %v2290_v3, 0.0  ;;  %v273_v49 = vmax.f32 %v2295_v7, 0.0  ;;  %v317_v50 = vand.u32 2147483647, %v2330_v42 }
  0x24   : > { %1945 = vpow2.f32 %v379_v38  ;;  %v288_v51 = vmax.f32 %v2298_v8, 0.0  ;;  %v272_v52 = vmax.f32 %v2303_v14, 0.0  ;;  %v355_v53 = vmul.f32 1.442695, %v323_v47 }
  0x25   : > { %1947 = vpow2.f32 %v409_v40  ;;  %v334_v54 = vsub.f32 0.0, %v302_v44  ;;  %v287_v56 = vmax.f32 %v2307_v20, 0.0  ;;  %v271_v57 = vmax.f32 %v2311_v23, 0.0 }
  0x26   : > { %v286_v58 = vmax.f32 %v2314_v26, 0.0  ;;  %1949 = vpow2.f32 %v387_v43  ;;  %v349_v6 = vsub.f32 0.0, %v317_v50  ;;  %v3293_v26 = vmax.f32 %v2318_v29, 0.0 }
  0x27   : > { %1951 = vpow2.f32 %v355_v53  ;;  %v377_v13 = vmul.f32 1.442695, %v334_v54 }
  0x28   : > { %v2353_v31 = vmul.f32 1.442695, %v349_v6 }
  0x2a   : > { %v1932_v55 = vpop.eup %1931 }
  0x2b   : > { %v1934_v59 = vpop.eup %1933  ;;  %v698_v60 = vadd.f32 1.0, %v1932_v55  ;;  %v701_v61 = vmul.f32 -0.5, %v1932_v55  ;;  %v704_v17 = vand.u32 2147483647, %v1932_v55 }
  0x2c   : > { %v1936_v2 = vpop.eup %1935  ;;  %v554_v4 = vadd.f32 1.0, %v1934_v59  ;;  %v557_v5 = vmul.f32 -0.5, %v1934_v59  ;;  %v560_v21 = vand.u32 2147483647, %v1934_v59 }
  0x2d   : > { %v1938_v10 = vpop.eup %1937  ;;  %1953 = vlog2.f32 %v698_v60  ;;  %v689_v11 = vadd.f32 1.0, %v1936_v2  ;;  %v702_v16 = vadd.f32 1.0, %v701_v61  ;;  %v692_v18 = vmul.f32 -0.5, %v1936_v2 }
  0x2e   : > { %v1940_v15 = vpop.eup %1939  ;;  %1955 = vlog2.f32 %v554_v4  ;;  %v545_v22 = vadd.f32 1.0, %v1938_v10  ;;  %v558_v27 = vadd.f32 1.0, %v557_v5  ;;  %v695_v28 = vand.u32 2147483647, %v1936_v2 }
  0x2f   : > { %1957 = vlog2.f32 %v689_v11  ;;  %v1942_v25 = vpop.eup %1941  ;;  %v548_v30 = vmul.f32 -0.5, %v1938_v10  ;;  %v680_v33 = vadd.f32 1.0, %v1940_v15  ;;  %v683_v34 = vmul.f32 -0.5, %v1940_v15 }
  0x30   : > { %v1944_v32 = vpop.eup %1943  ;;  %1959 = vlog2.f32 %v545_v22  ;;  %v703_v38 = vmul.f32 %v1932_v55, %v702_v16  ;;  %vm2356_vm0 = vcmp.lt.f32.partialorder %v704_v17, 0.0004427343  ;;  %v693_v40 = vadd.f32 1.0, %v692_v18 }
  0x31   : > { %1961 = vpow2.f32 %v377_v13  ;;  %v1946_v41 = vpop.eup %1945  ;;  %vm2360_vm1 = vcmp.lt.f32.partialorder %v560_v21, 0.0004427343  ;;  %v551_v44 = vand.u32 2147483647, %v1938_v10  ;;  %v536_v47 = vadd.f32 1.0, %v1942_v25 }
  0x32   : > { %1963 = vlog2.f32 %v680_v33  ;;  %v539_v50 = vmul.f32 -0.5, %v1942_v25  ;;  %v559_v53 = vmul.f32 %v1934_v59, %v558_v27  ;;  %vm2364_vm2 = vcmp.lt.f32.partialorder %v695_v28, 0.0004427343  ;;  %v1948_v61 = vpop.eup %1947 }
  0x33   : > { %v549_v55 = vadd.f32 1.0, %v548_v30  ;;  %v671_v60 = vadd.f32 1.0, %v1944_v32  ;;  %v684_v4 = vadd.f32 1.0, %v683_v34  ;;  %v686_v5 = vand.u32 2147483647, %v1940_v15  ;;  %v1950_v17 = vpop.eup %1949 }
  0x34   : > { %1965 = vlog2.f32 %v536_v47  ;;  %v674_v6 = vmul.f32 -0.5, %v1944_v32  ;;  %v694_v11 = vmul.f32 %v1936_v2, %v693_v40  ;;  %v542_v13 = vand.u32 2147483647, %v1942_v25  ;;  %v2372_v33 = vpop.eup %1951 }
  0x35   : > { %1967 = vlog2.f32 %v671_v60  ;;  %v527_v16 = vadd.f32 1.0, %v1946_v41  ;;  %vm2368_vm3 = vcmp.lt.f32.partialorder %v551_v44, 0.0004427343  ;;  %v540_v59 = vadd.f32 1.0, %v539_v50 }
  0x36   : > { %v675_v21 = vadd.f32 1.0, %v674_v6  ;;  %v530_v22 = vmul.f32 -0.5, %v1946_v41  ;;  %v677_v27 = vand.u32 2147483647, %v1944_v32  ;;  %v662_v28 = vadd.f32 1.0, %v1948_v61 }
  0x37   : > { %1969 = vlog2.f32 %v527_v16  ;;  %v665_v30 = vmul.f32 -0.5, %v1948_v61  ;;  %v550_v34 = vmul.f32 %v1938_v10, %v549_v55  ;;  %v685_v47 = vmul.f32 %v1940_v15, %v684_v4 }
  0x38   : > { %vm2374_vm4 = vcmp.lt.f32.partialorder %v686_v5, 0.0004427343  ;;  %v531_v40 = vadd.f32 1.0, %v530_v22  ;;  %vm2378_vm5 = vcmp.lt.f32.partialorder %v542_v13, 0.0004427343  ;;  %1971 = vlog2.f32 %v662_v28 }
  0x39   : > { %v533_v50 = vand.u32 2147483647, %v1946_v41  ;;  %v563_v6 = vadd.f32 1.0, %v1950_v17  ;;  %v566_v16 = vmul.f32 -0.5, %v1950_v17  ;;  %v541_v62 = vmul.f32 %v1942_v25, %v540_v59 }
  0x3a   : > { %v1954_v44 = vpop.eup %1953  ;;  %v2382_v35 = vmul.f32 %v1944_v32, %v675_v21  ;;  %v668_v10 = vand.u32 2147483647, %v1948_v61  ;;  %vm2384_vm6 = vcmp.lt.f32.partialorder %v677_v27, 0.0004427343  ;;  %v2388_v5 = vmul.f32 %v1946_v41, %v531_v40 }
  0x3b   : > { %v1956_v12 = vpop.eup %1955  ;;  %v700_v63 = vmul.f32 0.6931472, %v1954_v44  ;;  %v666_v13 = vadd.f32 1.0, %v665_v30  ;;  %1973 = vlog2.f32 %v563_v6  ;;  %v567_v24 = vadd.f32 1.0, %v566_v16 }
  0x3c   : > { %v1958_v15 = vpop.eup %1957  ;;  %v556_v55 = vmul.f32 0.6931472, %v1956_v12  ;;  %v419_v25 = vadd.f32 1.0, %v2372_v33  ;;  %vm2397_vm7 = vcmp.lt.f32.partialorder %v533_v50, 0.0004427343  ;;  %v422_v27 = vmul.f32 -0.5, %v2372_v33 }
  0x3d   : > { %v706_v22 = vsel %vm2356_vm0, %v703_v38, %v700_v63  ;;  %v691_v28 = vmul.f32 0.6931472, %v1958_v15  ;;  %v1960_v32 = vpop.eup %1959  ;;  %v569_v41 = vand.u32 2147483647, %v1950_v17  ;;  %v667_v30 = vmul.f32 %v1948_v61, %v666_v13 }
  0x3e   : > { %v738_v59 = vadd.f32 %v706_v22, %v290_v45  ;;  %v562_v12 = vsel %vm2360_vm1, %v559_v53, %v556_v55  ;;  %v2402_v39 = vpop.eup %1961  ;;  %v547_v0 = vmul.f32 0.6931472, %v1960_v32  ;;  %1975 = vlog2.f32 %v419_v25 }
  0x3f   : > { %v722_v63 = vadd.f32 %v562_v12, %v274_v46  ;;  %v697_v38 = vsel %vm2364_vm2, %v694_v11, %v691_v28  ;;  %v1964_v45 = vpop.eup %1963  ;;  %vm2410_vm8 = vcmp.lt.f32.partialorder %v668_v10, 0.0004427343  ;;  %v2416_v50 = vmul.f32 %v1950_v17, %v567_v24 }
  0x40   : > { %v770_v43 = vmul.f32 2.0, %v738_v59  ;;  %v737_v53 = vadd.f32 %v697_v38, %v289_v48  ;;  %v553_v1 = vsel %vm2368_vm3, %v550_v34, %v547_v0  ;;  %v682_v46 = vmul.f32 0.6931472, %v1964_v45 }
  0x41   : > { %v754_v44 = vmul.f32 2.0, %v722_v63  ;;  %v1966_v54 = vpop.eup %1965  ;;  %v721_v16 = vadd.f32 %v553_v1, %v273_v49  ;;  %vm2420_vm9 = vcmp.lt.f32.partialorder %v569_v41, 0.0004427343  ;;  %v423_v48 = vadd.f32 1.0, %v422_v27  ;;  %v2473_v1 = vld [vmem:[%s2280_s28 + $0x50] sm:$0xff] }
  0x42   : > { %v802_v11 = vmul.f32 %v770_v43, %v738_v59  ;;  %v769_v6 = vmul.f32 2.0, %v737_v53  ;;  %v1968_v61 = vpop.eup %1967  ;;  %v688_v18 = vsel %vm2374_vm4, %v685_v47, %v682_v46  ;;  %v538_v34 = vmul.f32 0.6931472, %v1966_v54  ;;  %v2476_v46 = vld [vmem:[%s2280_s28 + $0xc8] sm:$0xff] }
  0x43   : > { %v786_v10 = vmul.f32 %v754_v44, %v722_v63  ;;  %v518_v24 = vadd.f32 1.0, %v2402_v39  ;;  %v753_v15 = vmul.f32 2.0, %v721_v16  ;;  %v736_v7 = vadd.f32 %v688_v18, %v288_v51  ;;  %v225_v18 = vld [vmem:[%s2455_s4 + $0xf0] sm:$0xff] }
  0x44   : > { %1977 = vrcp.f32 %v802_v11  ;;  %v801_v17 = vmul.f32 %v769_v6, %v737_v53  ;;  %v1970_v49 = vpop.eup %1969  ;;  %v544_v55 = vsel %vm2378_vm5, %v541_v62, %v538_v34  ;;  %v673_v13 = vmul.f32 0.6931472, %v1968_v61 }
  0x45   : > { %1979 = vrcp.f32 %v786_v10  ;;  %v425_v22 = vand.u32 2147483647, %v2372_v33  ;;  %v785_v2 = vmul.f32 %v753_v15, %v721_v16  ;;  %v768_v47 = vmul.f32 2.0, %v736_v7  ;;  %v1972_v25 = vpop.eup %1971  ;;  %v210_v16 = vld [vmem:[%s2455_s4 + $0x78] sm:$0xff] }
  0x46   : > { %1981 = vrcp.f32 %v801_v17  ;;  %v720_v28 = vadd.f32 %v544_v55, %v272_v52  ;;  %v679_v8 = vsel %vm2384_vm6, %v2382_v35, %v673_v13  ;;  %v529_v51 = vmul.f32 0.6931472, %v1970_v49  ;;  %v209_v13 = vld [vmem:[%s2455_s4 + $0x70] sm:$0xff] }
  0x47   : > { %1983 = vlog2.f32 %v518_v24  ;;  %v521_v62 = vmul.f32 -0.5, %v2402_v39  ;;  %v800_v60 = vmul.f32 %v768_v47, %v736_v7  ;;  %v735_v59 = vadd.f32 %v679_v8, %v287_v56  ;;  %v2502_v47 = vld [vmem:[%s2280_s28 + $0x90] sm:$0xff]  ;;  %v224_v8 = vld [vmem:[%s2455_s4 + $0xe8] sm:$0xff] }
  0x48   : > { %1985 = vrcp.f32 %v785_v2  ;;  %v752_v32 = vmul.f32 2.0, %v720_v28  ;;  %v1974_v12 = vpop.eup %1973  ;;  %v535_v14 = vsel %vm2397_vm7, %v2388_v5, %v529_v51  ;;  %v664_v52 = vmul.f32 0.6931472, %v1972_v25 }
  0x49   : > { %v424_v4 = vmul.f32 %v2372_v33, %v423_v48  ;;  %vm2444_vm11 = vcmp.lt.f32.partialorder %v425_v22, 0.0004427343  ;;  %1987 = vrcp.f32 %v800_v60  ;;  %v767_v27 = vmul.f32 2.0, %v735_v59  ;;  %v2514_v60 = vld [vmem:[%s2280_s28 + $0x10] sm:$0xff] }
  0x4a   : > { %v784_v41 = vmul.f32 %v752_v32, %v720_v28  ;;  %v719_v63 = vadd.f32 %v535_v14, %v271_v57  ;;  %v670_v20 = vsel %vm2410_vm8, %v667_v30, %v664_v52  ;;  %v565_v56 = vmul.f32 0.6931472, %v1974_v12  ;;  %v226_v30 = vld [vmem:[%s2455_s4 + $0xf8] sm:$0xff] }
  0x4b   : > { %v522_v33 = vadd.f32 1.0, %v521_v62  ;;  %1989 = vpow2.f32 %v2353_v31  ;;  %v1976_v5 = vpop.eup %1975  ;;  %v799_v23 = vmul.f32 %v767_v27, %v735_v59  ;;  %v734_v21 = vadd.f32 %v670_v20, %v286_v58 }
  0x4c   : > { %1991 = vrcp.f32 %v784_v41  ;;  %v751_v57 = vmul.f32 2.0, %v719_v63  ;;  %v571_v38 = vsel %vm2420_vm9, %v2416_v50, %v565_v56  ;;  %v421_v0 = vmul.f32 0.6931472, %v1976_v5  ;;  %v208_v41 = vld [vmem:[%s2455_s4 + $0x68] sm:$0xff] }
  0x4d   : > { %v3291_v45 = vand.u32 2147483647, %v2346_v9  ;;  %v3292_v53 = vand.u32 2147483647, %v2350_v19  ;;  %1993 = vrcp.f32 %v799_v23  ;;  %v766_v44 = vmul.f32 2.0, %v734_v21 }
  0x4e   : > { %v783_v40 = vmul.f32 %v751_v57, %v719_v63  ;;  %v723_v58 = vadd.f32 %v571_v38, %v3293_v26  ;;  %v427_v50 = vsel %vm2444_vm11, %v424_v4, %v421_v0  ;;  %v524_v54 = vand.u32 2147483647, %v2402_v39 }
  0x4f   : > { %v340_v43 = vsub.f32 0.0, %v3291_v45  ;;  %v324_v31 = vsub.f32 0.0, %v3292_v53  ;;  %v798_v3 = vmul.f32 %v766_v44, %v734_v21  ;;  %v3294_v61 = vmax.f32 %v2323_v36, 0.0  ;;  %v223_v21 = vld [vmem:[%s2455_s4 + $0xe0] sm:$0xff]  ;;  %v2545_v53 = vld [vmem:[%s2280_s28 + $0x48] sm:$0xff] }
  0x50   : > { %1995 = vrcp.f32 %v783_v40  ;;  %v755_v48 = vmul.f32 2.0, %v723_v58  ;;  %v523_v34 = vmul.f32 %v2402_v39, %v522_v33  ;;  %v301_v24 = vand.u32 2147483647, %v2473_v1  ;;  %v211_v40 = vld [vmem:[%s2455_s4 + $0x80] sm:$0xff] }
  0x51   : > { %v389_v11 = vmul.f32 1.442695, %v340_v43  ;;  %v357_v6 = vmul.f32 1.442695, %v324_v31  ;;  %v707_v10 = vadd.f32 %v427_v50, %v3294_v61  ;;  %v2484_v29 = vpop.eup %1977  ;;  %v316_v17 = vand.u32 2147483647, %v2476_v46 }
  0x52   : > { %v2490_v15 = vpop.eup %1979  ;;  %1824 = vmatprep.subr.msk.mxu0 %vm868_vm10, %v2484_v29  ;;  %v1070_v36 = vmul.f32 %v2484_v29, %v226_v30  ;;  %v787_v7 = vmul.f32 %v755_v48, %v723_v58  ;;  %v333_v22 = vsub.f32 0.0, %v301_v24  ;;  %vm2509_vm12 = vcmp.lt.f32.partialorder %v524_v54, 0.0004427343  ;;  %v207_v30 = vld [vmem:[%s2455_s4 + $0x60] sm:$0xff]  ;;  %v212_v54 = vld [vmem:[%s2455_s4 + $0x88] sm:$0xff] }
  0x53   : > { %1997 = vpow2.f32 %v389_v11  ;;  %v739_v49 = vmul.f32 2.0, %v707_v10  ;;  %v2495_v55 = vpop.eup %1981  ;;  %1825 = vmatpush3.xpose.msk.msra.mxu0 %vm868_vm10, %v2490_v15  ;;  %v1054_v39 = vmul.f32 %v2490_v15, %v210_v16  ;;  %v348_v2 = vsub.f32 0.0, %v316_v17  ;;  %v195_v44 = vld [vmem:[%s2455_s4] sm:$0xff]  ;;  %v196_v16 = vld [vmem:[%s2455_s4 + $0x8] sm:$0xff] }
  0x54   : > { %1999 = vrcp.f32 %v798_v3  ;;  %v1984_v28 = vpop.eup %1983  ;;  %1858 = vmatprep.subr.msk.mxu1 %vm868_vm10, %v1070_v36  ;;  %1826 = vmatprep.subr.msk.mxu0 %vm868_vm10, %v2495_v55  ;;  %v1069_v25 = vmul.f32 %v2495_v55, %v225_v18  ;;  %v375_v12 = vmul.f32 1.442695, %v333_v22  ;;  %v309_v4 = vand.u32 2147483647, %v2502_v47 }
  0x55   : > { %2001 = vpow2.f32 %v357_v6  ;;  %v771_v51 = vmul.f32 %v739_v49, %v707_v10  ;;  %v2516_v32 = vpop.eup %1985  ;;  %1859 = vmatpush3.xpose.msk.msra.mxu1 %vm868_vm10, %v1054_v39  ;;  %v520_v59 = vmul.f32 0.6931472, %v1984_v28  ;;  %v405_v14 = vmul.f32 1.442695, %v348_v2  ;;  %v222_v6 = vld [vmem:[%s2455_s4 + $0xd8] sm:$0xff] }
  0x56   : > { %2003 = vrcp.f32 %v787_v7  ;;  %1860 = vmatprep.subr.msk.mxu1 %vm868_vm10, %v1069_v25  ;;  %v1053_v52 = vmul.f32 %v2516_v32, %v209_v13  ;;  %v2522_v35 = vpop.eup %1987  ;;  %v293_v63 = vand.u32 2147483647, %v2514_v60  ;;  %v3297_v33 = vmax.f32 %v2326_v37, 0.0  ;;  %v2590_v25 = vld [vmem:[%s2280_s28 + $0x98] sm:$0xff] }
  0x57   : > { %2005 = vrcp.f32 %v771_v51  ;;  %1827 = vmatpush3.xpose.msk.msra.mxu0 %vm868_vm10, %v2516_v32  ;;  %v526_v27 = vsel %vm2509_vm12, %v523_v34, %v520_v59  ;;  %v1068_v56 = vmul.f32 %v2522_v35, %v224_v8  ;;  %v341_v23 = vsub.f32 0.0, %v309_v4  ;;  %v2569_v34 = vld [vmem:[%s2280_s28 + $0xc0] sm:$0xff] }
  0x58   : > { %2007 = vpow2.f32 %v375_v12  ;;  %v2530_v20 = vpop.eup %1989  ;;  %1828 = vmatprep.subr.msk.mxu0 %vm868_vm10, %v2522_v35  ;;  %v718_v5 = vadd.f32 %v526_v27, %v3297_v33  ;;  %v325_v0 = vsub.f32 0.0, %v293_v63  ;;  %v300_v3 = vand.u32 2147483647, %v2545_v53 }
  0x59   : > { %2009 = vpow2.f32 %v405_v14  ;;  %v2537_v57 = vpop.eup %1991  ;;  %1861 = vmatpush3.xpose.msk.msra.mxu1 %vm868_vm10, %v1053_v52  ;;  %v653_v38 = vadd.f32 1.0, %v2530_v20  ;;  %v391_v43 = vmul.f32 1.442695, %v341_v23  ;;  %v1257_v10 = vmul.f32 %v211_v40, %v211_v40 }
  0x5a   : > { %1862 = vmatprep.subr.msk.mxu1 %vm868_vm10, %v1068_v56  ;;  %v1052_v45 = vmul.f32 %v2537_v57, %v208_v41  ;;  %v750_v37 = vmul.f32 2.0, %v718_v5  ;;  %v2547_v31 = vpop.eup %1993  ;;  %v359_v26 = vmul.f32 1.442695, %v325_v0  ;;  %v1241_v18 = vmul.f32 %v195_v44, %v195_v44 }
  0x5b   : > { %1829 = vmatpush3.xpose.msk.msra.mxu0 %vm868_vm10, %v2537_v57  ;;  %2011 = vlog2.f32 %v653_v38  ;;  %v1067_v58 = vmul.f32 %v2547_v31, %v223_v21  ;;  %v285_v17 = vmax.f32 %v2330_v42, 0.0  ;;  %v656_v36 = vmul.f32 -0.5, %v2530_v20 }
  0x5c   : > { %1830 = vmatprep.subr.msk.mxu0 %vm868_vm10, %v2547_v31  ;;  %v782_v50 = vmul.f32 %v750_v37, %v718_v5  ;;  %2013 = vpow2.f32 %v391_v43  ;;  %v2578_v49 = vmul.f32 %v212_v54, %v212_v54  ;;  %v276_v22 = vmax.f32 %v2346_v9, 0.0  ;;  %v2682_v9 = vld [vmem:[%s3263_s0] sm:$0xff] }
  0x5d   : > { %v2558_v11 = vpop.eup %1995  ;;  %1863 = vmatpush3.xpose.msk.msra.mxu1 %vm868_vm10, %v1052_v45  ;;  %2015 = vpow2.f32 %v359_v26  ;;  %v260_v2 = vmax.f32 %v2350_v19, 0.0  ;;  %v2587_v28 = vmul.f32 %v196_v16, %v196_v16  ;;  %v332_v62 = vsub.f32 0.0, %v300_v3  ;;  %1890 = vmatprep.mubr.msk.f32.mxu1 %vm868_vm10, %v2682_v9 }
  0x5e   : > { %1864 = vmatprep.subr.msk.mxu1 %vm868_vm10, %v1067_v58  ;;  %v1051_v61 = vmul.f32 %v2558_v11, %v207_v30  ;;  %2017 = vrcp.f32 %v782_v50  ;;  %v315_v59 = vand.u32 2147483647, %v2569_v34  ;;  %v269_v52 = vmax.f32 %v2473_v1, 0.0 }
  0x5f   : > { %1831 = vmatpush3.xpose.msk.msra.mxu0 %vm868_vm10, %v2558_v11  ;;  %v284_v4 = vmax.f32 %v2476_v46, 0.0  ;;  %v657_v27 = vadd.f32 1.0, %v656_v36  ;;  %v659_v63 = vand.u32 2147483647, %v2530_v20  ;;  %v310_v56 = vand.u32 2147483647, %v2590_v25 }
  0x60   : > { %v2564_v48 = vpop.eup %1997  ;;  %v277_v38 = vmax.f32 %v2502_v47, 0.0  ;;  %v373_v43 = vmul.f32 1.442695, %v332_v62  ;;  %v347_v30 = vsub.f32 0.0, %v315_v59  ;;  %v2625_v36 = vld [vmem:[%s2455_s4 + $0x58] sm:$0xff]  ;;  %v268_v47 = vmax.f32 %v2545_v53, 0.0 }
  0x61   : > { %v2571_v24 = vpop.eup %1999  ;;  %v572_v7 = vadd.f32 1.0, %v2564_v48  ;;  %1865 = vmatpush3.xpose.msk.msra.mxu1 %vm868_vm10, %v1051_v61  ;;  %v575_v14 = vmul.f32 -0.5, %v2564_v48  ;;  %v578_v21 = vand.u32 2147483647, %v2564_v48  ;;  %v658_v50 = vmul.f32 %v2530_v20, %v657_v27 }
  0x62   : > { %v2580_v39 = vpop.eup %2001  ;;  %1832 = vmatprep.subr.msk.mxu0 %vm868_vm10, %v2571_v24  ;;  %v1066_v13 = vmul.f32 %v2571_v24, %v222_v6  ;;  %vm2613_vm13 = vcmp.lt.f32.partialorder %v659_v63, 0.0004427343  ;;  %v342_v6 = vsub.f32 0.0, %v310_v56 }
  0x63   : > { %v2592_v8 = vpop.eup %2003  ;;  %2019 = vlog2.f32 %v572_v7  ;;  %v428_v51 = vadd.f32 1.0, %v2580_v39  ;;  %v431_v45 = vmul.f32 -0.5, %v2580_v39  ;;  %v576_v44 = vadd.f32 1.0, %v575_v14 }
  0x64   : > { %v1289_v12 = vmul.f32 %v2592_v8, %v1257_v10  ;;  %1866 = vmatprep.subr.msk.mxu1 %vm868_vm10, %v1066_v13  ;;  %v2602_v41 = vpop.eup %2005  ;;  %vm2617_vm14 = vcmp.lt.f32.partialorder %v578_v21, 0.0004427343  ;;  %v434_v61 = vand.u32 2147483647, %v2580_v39  ;;  %v403_v14 = vmul.f32 1.442695, %v347_v30 }
  0x65   : > { %2021 = vlog2.f32 %v428_v51  ;;  %v2008_v33 = vpop.eup %2007  ;;  %v1273_v23 = vmul.f32 %v2602_v41, %v1241_v18  ;;  %v432_v7 = vadd.f32 1.0, %v431_v45  ;;  %v577_v62 = vmul.f32 %v2564_v48, %v576_v44  ;;  %v2637_v21 = vld [vmem:[%s2280_s28 + $0x18] sm:$0xff]  ;;  %v2655_v44 = vld [vmem:[%s2280_s28 + $0x40] sm:$0xff] }
  0x66   : > { %v1353_v5 = vsel %vm868_vm10, %v1289_v12, 0.0  ;;  %v2010_v0 = vpop.eup %2009  ;;  %v509_v37 = vadd.f32 1.0, %v2008_v33  ;;  %v512_v26 = vmul.f32 -0.5, %v2008_v33  ;;  %v515_v13 = vand.u32 2147483647, %v2008_v33 }
  0x67   : > { %1354 = vadd.xlane.f32.xlu1 %v1353_v5  ;;  %v1305_v40 = vsel %vm868_vm10, %v1273_v23, 0.0  ;;  %v644_v58 = vadd.f32 1.0, %v2010_v0  ;;  %v647_v10 = vmul.f32 -0.5, %v2010_v0  ;;  %v650_v56 = vand.u32 2147483647, %v2010_v0 }
  0x68   : > { %1306 = vadd.xlane.f32.xlu0 %v1305_v40  ;;  %2023 = vlog2.f32 %v509_v37  ;;  %v2012_v16 = vpop.eup %2011  ;;  %v513_v59 = vadd.f32 1.0, %v512_v26  ;;  %v393_v23 = vmul.f32 1.442695, %v342_v6  ;;  %vm2646_vm15 = vcmp.lt.f32.partialorder %v434_v61, 0.0004427343 }
  0x69   : > { %2025 = vlog2.f32 %v644_v58  ;;  %v2622_v18 = vpop.eup %2013  ;;  %v655_v20 = vmul.f32 0.6931472, %v2012_v16  ;;  %v648_v37 = vadd.f32 1.0, %v647_v10  ;;  %vm2650_vm0 = vcmp.lt.f32.partialorder %v515_v13, 0.0004427343 }
  0x6a   : > { %2027 = vpow2.f32 %v373_v43  ;;  %v2627_v51 = vpop.eup %2015  ;;  %v581_v12 = vadd.f32 1.0, %v2622_v18  ;;  %v433_v43 = vmul.f32 %v2580_v39, %v432_v7  ;;  %v294_v58 = vand.u32 2147483647, %v2637_v21  ;;  %v2660_v39 = vld [vmem:[%s2280_s28 + $0xb8] sm:$0xff] }
  0x6b   : > { %v2631_v27 = vpop.eup %2017  ;;  %v661_v63 = vsel %vm2613_vm13, %v658_v50, %v655_v20  ;;  %v437_v5 = vadd.f32 1.0, %v2627_v51  ;;  %vm2662_vm1 = vcmp.lt.f32.partialorder %v650_v56, 0.0004427343  ;;  %v584_v6 = vmul.f32 -0.5, %v2622_v18 }
  0x6c   : > { %1833 = vmatpush3.xpose.msk.msra.mxu0 %vm868_vm10, %v2631_v27  ;;  %v1050_v48 = vmul.f32 %v2631_v27, %v2625_v36  ;;  %v733_v45 = vadd.f32 %v661_v63, %v285_v17  ;;  %2029 = vlog2.f32 %v581_v12  ;;  %v514_v17 = vmul.f32 %v2008_v33, %v513_v59 }
  0x6d   : > { %2031 = vlog2.f32 %v437_v5  ;;  %v649_v10 = vmul.f32 %v2010_v0, %v648_v37  ;;  %v326_v20 = vsub.f32 0.0, %v294_v58  ;;  %v299_v7 = vand.u32 2147483647, %v2655_v44 }
  0x6e   : > { %1867 = vmatpush3.xpose.msk.msra.mxu1 %vm868_vm10, %v1050_v48  ;;  %v765_v42 = vmul.f32 2.0, %v733_v45  ;;  %2033 = vpow2.f32 %v403_v14  ;;  %v440_v59 = vmul.f32 -0.5, %v2627_v51  ;;  %v314_v12 = vand.u32 2147483647, %v2660_v39 }
  0x6f   : > { %2035 = vpow2.f32 %v393_v23  ;;  %v361_v63 = vmul.f32 1.442695, %v326_v20  ;;  %v331_v56 = vsub.f32 0.0, %v299_v7  ;;  %v585_v5 = vadd.f32 1.0, %v584_v6 }
  0x70   : > { %v2020_v26 = vpop.eup %2019  ;;  %v797_v61 = vmul.f32 %v765_v42, %v733_v45  ;;  %v587_v23 = vand.u32 2147483647, %v2622_v18  ;;  %v346_v48 = vsub.f32 0.0, %v314_v12  ;;  %v441_v30 = vadd.f32 1.0, %v440_v59 }
  0x71   : > { %v574_v50 = vmul.f32 0.6931472, %v2020_v26  ;;  %v371_v37 = vmul.f32 1.442695, %v331_v56  ;;  %v443_v42 = vand.u32 2147483647, %v2627_v51 }
  0x72   : > { %v2022_v16 = vpop.eup %2021  ;;  %2037 = vrcp.f32 %v797_v61  ;;  %v401_v61 = vmul.f32 1.442695, %v346_v48  ;;  %vm2706_vm2 = vcmp.lt.f32.partialorder %v587_v23, 0.0004427343  ;;  %v442_v12 = vmul.f32 %v2627_v51, %v441_v30 }
  0x73   : > { %v580_v33 = vsel %vm2617_vm14, %v577_v62, %v574_v50  ;;  %v430_v13 = vmul.f32 0.6931472, %v2022_v16  ;;  %2039 = vpow2.f32 %v361_v63  ;;  %v586_v16 = vmul.f32 %v2622_v18, %v585_v5 }
  0x74   : > { %v724_v14 = vadd.f32 %v580_v33, %v276_v22  ;;  %2041 = vpow2.f32 %v371_v37  ;;  %vm2711_vm3 = vcmp.lt.f32.partialorder %v443_v42, 0.0004427343 }
  0x75   : > { %v436_v0 = vsel %vm2646_vm15, %v433_v43, %v430_v13  ;;  %v2024_v3 = vpop.eup %2023  ;;  %v261_v43 = vmax.f32 %v2514_v60, 0.0  ;;  %v2699_v13 = vld [vmem:[%s2280_s28 + $0xa0] sm:$0xff] }
  0x76   : > { %v756_v62 = vmul.f32 2.0, %v724_v14  ;;  %v708_v45 = vadd.f32 %v436_v0, %v260_v2  ;;  %v2026_v22 = vpop.eup %2025  ;;  %v511_v26 = vmul.f32 0.6931472, %v2024_v3  ;;  %v311_v56 = vand.u32 2147483647, %v2699_v13  ;;  %v2731_v3 = vld [vmem:[%s2455_s4 + $0xd0] sm:$0xff] }
  0x77   : > { %v2688_v19 = vpop.eup %2027  ;;  %v646_v50 = vmul.f32 0.6931472, %v2026_v22 }
  0x78   : > { %v788_v2 = vmul.f32 %v756_v62, %v724_v14  ;;  %v740_v58 = vmul.f32 2.0, %v708_v45  ;;  %v517_v6 = vsel %vm2650_vm0, %v514_v17, %v511_v26  ;;  %v500_v60 = vadd.f32 1.0, %v2688_v19  ;;  %v2704_v17 = vld [vmem:[%s2455_s4 + $0x90] sm:$0xff] }
  0x79   : > { %v717_v7 = vadd.f32 %v517_v6, %v269_v52  ;;  %v652_v33 = vsel %vm2662_vm1, %v649_v10, %v646_v50  ;;  %v2030_v59 = vpop.eup %2029  ;;  %v2718_v14 = vld [vmem:[%s2455_s4 + $0x10] sm:$0xff]  ;;  %v2727_v23 = vmul.f32 %v2704_v17, %v2704_v17  ;;  %v503_v22 = vmul.f32 -0.5, %v2688_v19 }
  0x7a   : > { %2043 = vrcp.f32 %v788_v2  ;;  %v772_v20 = vmul.f32 %v740_v58, %v708_v45  ;;  %v732_v40 = vadd.f32 %v652_v33, %v284_v4  ;;  %v2032_v1 = vpop.eup %2031  ;;  %v583_v54 = vmul.f32 0.6931472, %v2030_v59 }
  0x7b   : > { %2045 = vlog2.f32 %v500_v60  ;;  %v749_v52 = vmul.f32 2.0, %v717_v7  ;;  %v2715_v46 = vpop.eup %2033  ;;  %v439_v63 = vmul.f32 0.6931472, %v2032_v1  ;;  %v2740_v30 = vmul.f32 %v2718_v14, %v2718_v14 }
  0x7c   : > { %2047 = vrcp.f32 %v772_v20  ;;  %v764_v4 = vmul.f32 2.0, %v732_v40  ;;  %v2721_v51 = vpop.eup %2035  ;;  %v589_v5 = vsel %vm2706_vm2, %v586_v16, %v583_v54  ;;  %v635_v48 = vadd.f32 1.0, %v2715_v46 }
  0x7d   : > { %2049 = vpow2.f32 %v401_v61  ;;  %v781_v0 = vmul.f32 %v749_v52, %v717_v7  ;;  %v725_v45 = vadd.f32 %v589_v5, %v277_v38  ;;  %v445_v37 = vsel %vm2711_vm3, %v442_v12, %v439_v63  ;;  %v2843_v12 = vld [vmem:[%s2280_s28 + $0xa8] sm:$0xff] }
  0x7e   : > { %v796_v62 = vmul.f32 %v764_v4, %v732_v40  ;;  %v709_v26 = vadd.f32 %v445_v37, %v261_v43  ;;  %v590_v42 = vadd.f32 1.0, %v2721_v51  ;;  %v343_v38 = vsub.f32 0.0, %v311_v56  ;;  %v2759_v40 = vld [vmem:[%s2280_s28 + $0x20] sm:$0xff] }
  0x7f   : > { %2051 = vrcp.f32 %v781_v0  ;;  %v2743_v2 = vpop.eup %2037  ;;  %v757_v58 = vmul.f32 2.0, %v725_v45  ;;  %v283_v6 = vmax.f32 %v2569_v34, 0.0  ;;  %v504_v61 = vadd.f32 1.0, %v503_v22 }
  0x80   : > { %2053 = vrcp.f32 %v796_v62  ;;  %1834 = vmatprep.subr.msk.mxu0 %vm868_vm10, %v2743_v2  ;;  %v1065_v43 = vmul.f32 %v2743_v2, %v2731_v3  ;;  %v741_v50 = vmul.f32 2.0, %v709_v26  ;;  %v2751_v16 = vpop.eup %2039  ;;  %v506_v20 = vand.u32 2147483647, %v2688_v19 }
  0x81   : > { %2055 = vlog2.f32 %v635_v48  ;;  %v789_v60 = vmul.f32 %v757_v58, %v725_v45  ;;  %v638_v7 = vmul.f32 -0.5, %v2715_v46  ;;  %v641_v33 = vand.u32 2147483647, %v2715_v46  ;;  %v2761_v18 = vpop.eup %2041 }
  0x82   : > { %2057 = vlog2.f32 %v590_v42  ;;  %1868 = vmatprep.subr.msk.mxu1 %vm868_vm10, %v1065_v43  ;;  %v773_v53 = vmul.f32 %v741_v50, %v709_v26  ;;  %v446_v59 = vadd.f32 1.0, %v2751_v16  ;;  %v593_v1 = vmul.f32 -0.5, %v2721_v51  ;;  %v2791_v43 = vld [vmem:[%s2455_s4 + $0x50] sm:$0xff] }
  0x83   : > { %2059 = vrcp.f32 %v789_v60  ;;  %v395_v52 = vmul.f32 1.442695, %v343_v38  ;;  %v491_v4 = vadd.f32 1.0, %v2761_v18  ;;  %v505_v56 = vmul.f32 %v2688_v19, %v504_v61  ;;  %v2795_v61 = vld [vmem:[%s2455_s4 + $0xc8] sm:$0xff] }
  0x84   : > { %2061 = vrcp.f32 %v773_v53  ;;  %vm2771_vm4 = vcmp.lt.f32.partialorder %v506_v20, 0.0004427343  ;;  %v295_v5 = vand.u32 2147483647, %v2759_v40  ;;  %v639_v45 = vadd.f32 1.0, %v638_v7 }
  0x85   : > { %2063 = vlog2.f32 %v446_v59  ;;  %vm2778_vm5 = vcmp.lt.f32.partialorder %v641_v33, 0.0004427343  ;;  %v594_v26 = vadd.f32 1.0, %v593_v1  ;;  %v449_v42 = vmul.f32 -0.5, %v2751_v16 }
  0x86   : > { %2065 = vlog2.f32 %v491_v4  ;;  %v494_v50 = vmul.f32 -0.5, %v2761_v18  ;;  %v327_v60 = vsub.f32 0.0, %v295_v5  ;;  %v596_v53 = vand.u32 2147483647, %v2721_v51  ;;  %v2805_v4 = vld [vmem:[%s2280_s28 + $0x38] sm:$0xff] }
  0x87   : > { %v2768_v63 = vpop.eup %2043  ;;  %2067 = vpow2.f32 %v395_v52  ;;  %v452_v7 = vand.u32 2147483647, %v2751_v16  ;;  %v497_v1 = vand.u32 2147483647, %v2761_v18  ;;  %v595_v0 = vmul.f32 %v2721_v51, %v594_v26 }
  0x88   : > { %v2046_v48 = vpop.eup %2045  ;;  %v1290_v62 = vmul.f32 %v2768_v63, %v2578_v49  ;;  %v363_v52 = vmul.f32 1.442695, %v327_v60  ;;  %vm2824_vm6 = vcmp.lt.f32.partialorder %v596_v53, 0.0004427343  ;;  %v298_v26 = vand.u32 2147483647, %v2805_v4 }
  0x89   : > { %v2782_v19 = vpop.eup %2047  ;;  %v502_v22 = vmul.f32 0.6931472, %v2046_v48  ;;  %v450_v48 = vadd.f32 1.0, %v449_v42  ;;  %vm2831_vm7 = vcmp.lt.f32.partialorder %v452_v7, 0.0004427343  ;;  %vm1455_vm2 = vcmask 195712  }
  0x8a   : > { %v2785_v58 = vpop.eup %2049  ;;  %v1356_v38 = vsel %vm868_vm10, %v1290_v62, 0.0  ;;  %v1274_v49 = vmul.f32 %v2782_v19, %v2587_v28  ;;  %vm2835_vm8 = vcmp.lt.f32.partialorder %v497_v1, 0.0004427343  ;;  %v330_v10 = vsub.f32 0.0, %v298_v26 }
  0x8b   : > { %1357 = vadd.xlane.f32.xlu1 %v1356_v38  ;;  %v508_v20 = vsel %vm2771_vm4, %v505_v56, %v502_v22  ;;  %v626_v33 = vadd.f32 1.0, %v2785_v58  ;;  %v640_v56 = vmul.f32 %v2715_v46, %v639_v45  ;;  %v495_v38 = vadd.f32 1.0, %v494_v50 }
  0x8c   : > { %v1308_v59 = vsel %vm868_vm10, %v1274_v49, 0.0  ;;  %v716_v28 = vadd.f32 %v508_v20, %v268_v47  ;;  %v2807_v5 = vpop.eup %2051  ;;  %v2818_v49 = vld [vmem:[%s2280_s28 + $0xb0] sm:$0xff]  ;;  %v629_v45 = vmul.f32 -0.5, %v2785_v58  ;;  %vm1462_vm3 = vcmask 261312  }
  0x8d   : > { %1309 = vadd.xlane.f32.xlu0 %v1308_v59  ;;  %2069 = vlog2.f32 %v626_v33  ;;  %v2811_v62 = vpop.eup %2053  ;;  %1835 = vmatpush3.xpose.msk.msra.mxu0 %vm868_vm10, %v2807_v5  ;;  %v1049_v47 = vmul.f32 %v2807_v5, %v2791_v43  ;;  %v313_v54 = vand.u32 2147483647, %v2818_v49  ;;  %v496_v1 = vmul.f32 %v2761_v18, %v495_v38 }
  0x8e   : > { %v748_v22 = vmul.f32 2.0, %v716_v28  ;;  %2071 = vpow2.f32 %v363_v52  ;;  %v2056_v60 = vpop.eup %2055  ;;  %1836 = vmatprep.subr.msk.mxu0 %vm868_vm10, %v2811_v62  ;;  %v1064_v46 = vmul.f32 %v2811_v62, %v2795_v61  ;;  %v451_v52 = vmul.f32 %v2751_v16, %v450_v48 }
  0x8f   : > { %v2058_v42 = vpop.eup %2057  ;;  %1869 = vmatpush3.xpose.msk.msra.mxu1 %vm868_vm10, %v1049_v47  ;;  %v637_v20 = vmul.f32 0.6931472, %v2056_v60  ;;  %v632_v47 = vand.u32 2147483647, %v2785_v58  ;;  %v3322_v18 = vmax.f32 %v2590_v25, 0.0  ;;  %vm1469_vm4 = vcmask 326912  }
  0x90   : > { %v780_v50 = vmul.f32 %v748_v22, %v716_v28  ;;  %1870 = vmatprep.subr.msk.mxu1 %vm868_vm10, %v1064_v46  ;;  %v592_v53 = vmul.f32 0.6931472, %v2058_v42  ;;  %v2845_v28 = vpop.eup %2059  ;;  %v630_v46 = vadd.f32 1.0, %v629_v45  ;;  %v369_v38 = vmul.f32 1.442695, %v330_v10 }
  0x91   : > { %v643_v7 = vsel %vm2778_vm5, %v640_v56, %v637_v20  ;;  %v2851_v22 = vpop.eup %2061  ;;  %v1291_v16 = vmul.f32 %v2845_v28, %v2727_v23  ;;  %v312_v42 = vand.u32 2147483647, %v2843_v12  ;;  %vm633_vm9 = vcmp.lt.f32.partialorder %v632_v47, 0.0004427343  ;;  %v2888_v47 = vld [vmem:[%s2280_s28 + $0x30] sm:$0xff] }
  0x92   : > { %2073 = vrcp.f32 %v780_v50  ;;  %v731_v48 = vadd.f32 %v643_v7, %v283_v6  ;;  %v598_v60 = vsel %vm2824_vm6, %v595_v0, %v592_v53  ;;  %v2064_v26 = vpop.eup %2063  ;;  %v1275_v37 = vmul.f32 %v2851_v22, %v2740_v30 }
  0x93   : > { %v726_v56 = vadd.f32 %v598_v60, %v3322_v18  ;;  %v2066_v50 = vpop.eup %2065  ;;  %v1359_v23 = vsel %vm868_vm10, %v1291_v16, 0.0  ;;  %v448_v34 = vmul.f32 0.6931472, %v2064_v26  ;;  %v345_v6 = vsub.f32 0.0, %v313_v54 }
  0x94   : > { %v763_v20 = vmul.f32 2.0, %v731_v48  ;;  %v2865_v51 = vpop.eup %2067  ;;  %1360 = vadd.xlane.f32.xlu1 %v1359_v23  ;;  %v1311_v0 = vsel %vm868_vm10, %v1275_v37, 0.0  ;;  %v493_v30 = vmul.f32 0.6931472, %v2066_v50  ;;  %2075 = vpow2.f32 %v369_v38  ;;  %v2877_v37 = vld [vmem:[%s2280_s28 + $0x28] sm:$0xff] }
  0x95   : > { %v758_v45 = vmul.f32 2.0, %v726_v56  ;;  %1312 = vadd.xlane.f32.xlu0 %v1311_v0  ;;  %v454_v10 = vsel %vm2831_vm7, %v451_v52, %v448_v34  ;;  %v599_v53 = vadd.f32 1.0, %v2865_v51  ;;  %v3323_v16 = vmax.f32 %v2637_v21, 0.0  ;;  %v204_v23 = vld [vmem:[%s2455_s4 + $0x48] sm:$0xff] }
  0x96   : > { %v795_v25 = vmul.f32 %v763_v20, %v731_v48  ;;  %v499_v54 = vsel %vm2835_vm8, %v496_v1, %v493_v30  ;;  %v631_v26 = vmul.f32 %v2785_v58, %v630_v46  ;;  %v3324_v18 = vmax.f32 %v2655_v44, 0.0 }
  0x97   : > { %v790_v7 = vmul.f32 %v758_v45, %v726_v56  ;;  %v710_v60 = vadd.f32 %v454_v10, %v3323_v16  ;;  %v399_v33 = vmul.f32 1.442695, %v345_v6  ;;  %v344_v52 = vsub.f32 0.0, %v312_v42 }
  0x98   : > { %2077 = vrcp.f32 %v795_v25  ;;  %v715_v48 = vadd.f32 %v499_v54, %v3324_v18  ;;  %v282_v21 = vmax.f32 %v2660_v39, 0.0  ;;  %v296_v46 = vand.u32 2147483647, %v2877_v37  ;;  %v214_v25 = vld [vmem:[%s2455_s4 + $0x98] sm:$0xff] }
  0x99   : > { %2079 = vrcp.f32 %v790_v7  ;;  %v742_v56 = vmul.f32 2.0, %v710_v60  ;;  %v397_v34 = vmul.f32 1.442695, %v344_v52  ;;  %v602_v0 = vmul.f32 -0.5, %v2865_v51  ;;  %v2902_v52 = vld [vmem:[%s2455_s4 + $0xc0] sm:$0xff] }
  0x9a   : > { %v2070_v38 = vpop.eup %2069  ;;  %v747_v1 = vmul.f32 2.0, %v715_v48  ;;  %2081 = vlog2.f32 %v599_v53  ;;  %v328_v45 = vsub.f32 0.0, %v296_v46  ;;  %v2894_v53 = vld [vmem:[%s2455_s4 + $0x18] sm:$0xff]  ;;  %v297_v16 = vand.u32 2147483647, %v2888_v47 }
  0x9b   : > { %v2882_v59 = vpop.eup %2071  ;;  %v628_v58 = vmul.f32 0.6931472, %v2070_v38  ;;  %v774_v50 = vmul.f32 %v742_v56, %v710_v60  ;;  %2083 = vpow2.f32 %v399_v33  ;;  %v605_v54 = vand.u32 2147483647, %v2865_v51 }
  0x9c   : > { %v455_v44 = vadd.f32 1.0, %v2882_v59  ;;  %v779_v42 = vmul.f32 %v747_v1, %v715_v48  ;;  %v365_v7 = vmul.f32 1.442695, %v328_v45  ;;  %v1260_v18 = vmul.f32 %v214_v25, %v214_v25 }
  0x9d   : > { %v634_v20 = vsel %vm633_vm9, %v631_v26, %v628_v58  ;;  %2085 = vrcp.f32 %v774_v50  ;;  %v603_v48 = vadd.f32 1.0, %v602_v0  ;;  %v329_v33 = vsub.f32 0.0, %v297_v16 }
  0x9e   : > { %v730_v39 = vadd.f32 %v634_v20, %v282_v21  ;;  %2087 = vrcp.f32 %v779_v42  ;;  %v1244_v38 = vmul.f32 %v2894_v53, %v2894_v53  ;;  %v458_v56 = vmul.f32 -0.5, %v2882_v59 }
  0x9f   : > { %v2074_v6 = vpop.eup %2073  ;;  %2089 = vlog2.f32 %v455_v44  ;;  %v367_v1 = vmul.f32 1.442695, %v329_v33  ;;  %v1266_v58 = vmul.f32 %v2795_v61, %v2795_v61  ;;  %v1250_v46 = vmul.f32 %v204_v23, %v204_v23 }
  0xa0   : > { %1837 = vmatpush3.xpose.msk.msra.mxu0 %vm868_vm10, %v2074_v6  ;;  %v1048_v30 = vmul.f32 %v2074_v6, %v204_v23  ;;  %v762_v10 = vmul.f32 2.0, %v730_v39  ;;  %2091 = vpow2.f32 %v397_v34  ;;  %v1267_v50 = vmul.f32 %v2731_v3, %v2731_v3 }
  0xa1   : > { %v2899_v26 = vpop.eup %2075  ;;  %2093 = vpow2.f32 %v365_v7  ;;  %v279_v42 = vmax.f32 %v2699_v13, 0.0  ;;  %vm2915_vm11 = vcmp.lt.f32.partialorder %v605_v54, 0.0004427343  ;;  %v1251_v34 = vmul.f32 %v2791_v43, %v2791_v43 }
  0xa2   : > { %1871 = vmatpush3.xpose.msk.msra.mxu1 %vm868_vm10, %v1048_v30  ;;  %v794_v60 = vmul.f32 %v762_v10, %v730_v39  ;;  %v482_v21 = vadd.f32 1.0, %v2899_v26  ;;  %v604_v61 = vmul.f32 %v2865_v51, %v603_v48  ;;  %v2929_v13 = vmul.f32 %v2811_v62, %v1266_v58 }
  0xa3   : > { %v459_v45 = vadd.f32 1.0, %v458_v56  ;;  %v2935_v30 = vmul.f32 %v2074_v6, %v1250_v46  ;;  %v461_v7 = vand.u32 2147483647, %v2882_v59  ;;  %v2940_v51 = vmul.f32 %v2743_v2, %v1267_v50 }
  0xa4   : > { %2095 = vrcp.f32 %v794_v60  ;;  %v2946_v60 = vld [vmem:[%s2455_s4 + $0x40] sm:$0xff]  ;;  %v2950_v54 = vmul.f32 %v2807_v5, %v1251_v34  ;;  %v263_v58 = vmax.f32 %v2759_v40, 0.0  ;;  %v2975_v34 = vld [vmem:[%s2455_s4 + $0xb8] sm:$0xff]  ;;  %vm1476_vm5 = vcmask 392512  }
  0xa5   : > { %v2912_v44 = vpop.eup %2077  ;;  %2097 = vlog2.f32 %v482_v21  ;;  %v460_v21 = vmul.f32 %v2882_v59, %v459_v45  ;;  %vm2966_vm12 = vcmp.lt.f32.partialorder %v461_v7, 0.0004427343  ;;  %vm1483_vm6 = vcmask 458112  }
  0xa6   : > { %v2921_v39 = vpop.eup %2079  ;;  %1838 = vmatprep.subr.msk.mxu0 %vm868_vm10, %v2912_v44  ;;  %v1063_v3 = vmul.f32 %v2912_v44, %v2902_v52  ;;  %2099 = vpow2.f32 %v367_v1  ;;  %vm1490_vm7 = vcmask 523712   ;;  %vm1497_vm8 = vcmask 589312  }
  0xa7   : > { %v2082_v23 = vpop.eup %2081  ;;  %v2932_v0 = vmul.f32 %v2921_v39, %v214_v25  ;;  %v1292_v43 = vmul.f32 %v2921_v39, %v1260_v18  ;;  %v485_v25 = vmul.f32 -0.5, %v2899_v26  ;;  %vm1504_vm9 = vcmask 654912  }
  0xa8   : > { %1872 = vmatprep.subr.msk.mxu1 %vm868_vm10, %v1063_v3  ;;  %v601_v10 = vmul.f32 0.6931472, %v2082_v23  ;;  %v2942_v16 = vpop.eup %2083  ;;  %v488_v3 = vand.u32 2147483647, %v2899_v26 }
  0xa9   : > { %v1362_v62 = vsel %vm868_vm10, %v1292_v43, 0.0  ;;  %v617_v2 = vadd.f32 1.0, %v2942_v16  ;;  %v486_v20 = vadd.f32 1.0, %v485_v25  ;;  %v620_v7 = vmul.f32 -0.5, %v2942_v16 }
  0xaa   : > { %v2952_v6 = vpop.eup %2085  ;;  %1363 = vadd.xlane.f32.xlu1 %v1362_v62  ;;  %v607_v18 = vsel %vm2915_vm11, %v604_v61, %v601_v10  ;;  %vm489_vm13 = vcmp.lt.f32.partialorder %v488_v3, 0.0004427343  ;;  %v3005_v3 = vld [vmem:[%s2455_s4 + $0xa0] sm:$0xff]  ;;  %vm1511_vm11 = vcmask 720512  }
  0xab   : > { %v2957_v48 = vpop.eup %2087  ;;  %v1276_v33 = vmul.f32 %v2952_v6, %v1244_v38  ;;  %v727_v56 = vadd.f32 %v607_v18, %v279_v42  ;;  %2101 = vlog2.f32 %v617_v2  ;;  %v487_v25 = vmul.f32 %v2899_v26, %v486_v20 }
  0xac   : > { %v2090_v1 = vpop.eup %2089  ;;  %1839 = vmatpush3.xpose.msk.msra.mxu0 %vm868_vm10, %v2957_v48  ;;  %v1047_v5 = vmul.f32 %v2957_v48, %v2946_v60  ;;  %v3002_v20 = vmul.f32 %v2682_v9, %v2682_v9 }
  0xad   : > { %v2970_v50 = vpop.eup %2091  ;;  %v1314_v38 = vsel %vm868_vm10, %v1276_v33, 0.0  ;;  %v759_v42 = vmul.f32 2.0, %v727_v56  ;;  %v457_v59 = vmul.f32 0.6931472, %v2090_v1 }
  0xae   : > { %1315 = vadd.xlane.f32.xlu0 %v1314_v38  ;;  %1873 = vmatpush3.xpose.msk.msra.mxu1 %vm868_vm10, %v1047_v5  ;;  %v608_v40 = vadd.f32 1.0, %v2970_v50  ;;  %v2979_v61 = vpop.eup %2093  ;;  %v611_v46 = vmul.f32 -0.5, %v2970_v50 }
  0xaf   : > { %v791_v23 = vmul.f32 %v759_v42, %v727_v56  ;;  %v463_v43 = vsel %vm2966_vm12, %v460_v21, %v457_v59  ;;  %v464_v18 = vadd.f32 1.0, %v2979_v61  ;;  %v266_v56 = vmax.f32 %v2805_v4, 0.0  ;;  %1856 = vmatprep.mubr.msk.f32.mxu0 %vm868_vm10, %v3002_v20 }
  0xb0   : > { %v711_v10 = vadd.f32 %v463_v43, %v263_v58  ;;  %2103 = vlog2.f32 %v608_v40  ;;  %v621_v58 = vadd.f32 1.0, %v620_v7  ;;  %v623_v42 = vand.u32 2147483647, %v2942_v16 }
  0xb1   : > { %v2983_v45 = vpop.eup %2095  ;;  %2105 = vrcp.f32 %v791_v23  ;;  %v467_v4 = vmul.f32 -0.5, %v2979_v61  ;;  %v612_v43 = vadd.f32 1.0, %v611_v46  ;;  %v281_v7 = vmax.f32 %v2818_v49, 0.0 }
  0xb2   : > { %1840 = vmatprep.subr.msk.mxu0 %vm868_vm10, %v2983_v45  ;;  %v1062_v62 = vmul.f32 %v2983_v45, %v2975_v34  ;;  %v2098_v2 = vpop.eup %2097  ;;  %v743_v33 = vmul.f32 2.0, %v711_v10  ;;  %2107 = vlog2.f32 %v464_v18  ;;  %v622_v23 = vmul.f32 %v2942_v16, %v621_v58 }
  0xb3   : > { %v2993_v21 = vpop.eup %2099  ;;  %v484_v1 = vmul.f32 0.6931472, %v2098_v2  ;;  %vm624_vm14 = vcmp.lt.f32.partialorder %v623_v42, 0.0004427343  ;;  %v1261_v2 = vmul.f32 %v3005_v3, %v3005_v3  ;;  %v613_v49 = vmul.f32 %v2970_v50, %v612_v43 }
  0xb4   : > { %1874 = vmatprep.subr.msk.mxu1 %vm868_vm10, %v1062_v62  ;;  %v775_v5 = vmul.f32 %v743_v33, %v711_v10  ;;  %v473_v26 = vadd.f32 1.0, %v2993_v21  ;;  %v614_v62 = vand.u32 2147483647, %v2970_v50  ;;  %v3015_v33 = vld [vmem:[%s2455_s4 + $0x20] sm:$0xff]  ;;  %v476_v16 = vmul.f32 -0.5, %v2993_v21 }
  0xb5   : > { %v490_v38 = vsel %vm489_vm13, %v487_v25, %v484_v1  ;;  %v1245_v42 = vmul.f32 %v3015_v33, %v3015_v33  ;;  %vm1518_vm12 = vcmask 786112   ;;  %vm1525_vm13 = vcmask 851712  }
  0xb6   : > { %2109 = vrcp.f32 %v775_v5  ;;  %v714_v59 = vadd.f32 %v490_v38, %v266_v56  ;;  %v468_v56 = vadd.f32 1.0, %v467_v4  ;;  %v470_v5 = vand.u32 2147483647, %v2979_v61 }
  0xb7   : > { %2111 = vlog2.f32 %v473_v26  ;;  %v280_v26 = vmax.f32 %v2843_v12, 0.0  ;;  %vm615_vm15 = vcmp.lt.f32.partialorder %v614_v62, 0.0004427343  ;;  %v479_v12 = vand.u32 2147483647, %v2993_v21 }
  0xb8   : > { %v746_v40 = vmul.f32 2.0, %v714_v59  ;;  %v2102_v10 = vpop.eup %2101  ;;  %vm471_vm0 = vcmp.lt.f32.partialorder %v470_v5, 0.0004427343  ;;  %v265_v5 = vmax.f32 %v2888_v47, 0.0 }
  0xb9   : > { %v619_v18 = vmul.f32 0.6931472, %v2102_v10  ;;  %v477_v10 = vadd.f32 1.0, %v476_v16  ;;  %vm480_vm1 = vcmp.lt.f32.partialorder %v479_v12, 0.0004427343  ;;  %v217_v12 = vld [vmem:[%s2455_s4 + $0xb0] sm:$0xff] }
  0xba   : > { %v778_v25 = vmul.f32 %v746_v40, %v714_v59 }
  0xbb   : > { %v625_v1 = vsel %vm624_vm14, %v622_v23, %v619_v18  ;;  %v469_v23 = vmul.f32 %v2979_v61, %v468_v56  ;;  %v478_v56 = vmul.f32 %v2993_v21, %v477_v10  ;;  %vm1532_vm14 = vcmask 917312  }
  0xbc   : > { %2113 = vrcp.f32 %v778_v25  ;;  %v729_v46 = vadd.f32 %v625_v1, %v281_v7  ;;  %v264_v25 = vmax.f32 %v2877_v37, 0.0 }
  0xbd   : > { %v2104_v58 = vpop.eup %2103 }
  0xbe   : > { %v3021_v38 = vpop.eup %2105  ;;  %v610_v59 = vmul.f32 0.6931472, %v2104_v58  ;;  %v761_v40 = vmul.f32 2.0, %v729_v46 }
  0xbf   : > { %v1293_v4 = vmul.f32 %v3021_v38, %v1261_v2  ;;  %v2108_v50 = vpop.eup %2107 }
  0xc0   : > { %v616_v43 = vsel %vm615_vm15, %v613_v49, %v610_v59  ;;  %v793_v62 = vmul.f32 %v761_v40, %v729_v46  ;;  %v466_v1 = vmul.f32 0.6931472, %v2108_v50  ;;  %v202_v40 = vld [vmem:[%s2455_s4 + $0x38] sm:$0xff]  ;;  %vm1539_vm15 = vcmask 982912  }
  0xc1   : > { %v1365_v7 = vsel %vm868_vm10, %v1293_v4, 0.0  ;;  %v728_v18 = vadd.f32 %v616_v43, %v280_v26 }
  0xc2   : > { %1366 = vadd.xlane.f32.xlu1 %v1365_v7  ;;  %2115 = vrcp.f32 %v793_v62  ;;  %v472_v61 = vsel %vm471_vm0, %v469_v23, %v466_v1  ;;  %v200_v1 = vld [vmem:[%s2455_s4 + $0x28] sm:$0xff]  ;;  %vm1546_vm0 = vcmask 1048512  }
  0xc3   : > { %v3030_v58 = vpop.eup %2109  ;;  %v760_v2 = vmul.f32 2.0, %v728_v18  ;;  %v712_v49 = vadd.f32 %v472_v61, %v264_v25  ;;  %v216_v25 = vld [vmem:[%s2455_s4 + $0xa8] sm:$0xff] }
  0xc4   : > { %v2112_v16 = vpop.eup %2111  ;;  %v1277_v37 = vmul.f32 %v3030_v58, %v1245_v42  ;;  %v1262_v62 = vmul.f32 %v216_v25, %v216_v25 }
  0xc5   : > { %v792_v59 = vmul.f32 %v760_v2, %v728_v18  ;;  %v475_v46 = vmul.f32 0.6931472, %v2112_v16  ;;  %v744_v4 = vmul.f32 2.0, %v712_v49  ;;  %v1263_v2 = vmul.f32 %v217_v12, %v217_v12 }
  0xc6   : > { %v1317_v26 = vsel %vm868_vm10, %v1277_v37, 0.0  ;;  %v201_v37 = vld [vmem:[%s2455_s4 + $0x30] sm:$0xff] }
  0xc7   : > { %1318 = vadd.xlane.f32.xlu0 %v1317_v26  ;;  %2117 = vrcp.f32 %v792_v59  ;;  %v481_v23 = vsel %vm480_vm1, %v478_v56, %v475_v46  ;;  %v776_v50 = vmul.f32 %v744_v4, %v712_v49  ;;  %v1246_v56 = vmul.f32 %v200_v1, %v200_v1 }
  0xc8   : > { %v713_v21 = vadd.f32 %v481_v23, %v265_v5  ;;  %v1264_v5 = vmul.f32 %v2975_v34, %v2975_v34  ;;  %v1247_v4 = vmul.f32 %v201_v37, %v201_v37  ;;  %v1248_v23 = vmul.f32 %v202_v40, %v202_v40 }
  0xc9   : > { %v2114_v10 = vpop.eup %2113  ;;  %2119 = vrcp.f32 %v776_v50  ;;  %v1249_v34 = vmul.f32 %v2946_v60, %v2946_v60  ;;  %v1059_v60 = vmul.f32 %v3021_v38, %v3005_v3 }
  0xca   : > { %1841 = vmatpush3.xpose.msk.msra.mxu0 %vm868_vm10, %v2114_v10  ;;  %v1046_v42 = vmul.f32 %v2114_v10, %v202_v40  ;;  %v745_v47 = vmul.f32 2.0, %v713_v21 }
  0xcc   : > { %1875 = vmatpush3.xpose.msk.msra.mxu1 %vm868_vm10, %v1046_v42  ;;  %v777_v43 = vmul.f32 %v745_v47, %v713_v21  ;;  %v1296_v21 = vmul.f32 %v2983_v45, %v1264_v5  ;;  %v1265_v42 = vmul.f32 %v2902_v52, %v2902_v52 }
  0xce   : > { %2121 = vrcp.f32 %v777_v43  ;;  %v1374_v45 = vsel %vm868_vm10, %v1296_v21, 0.0  ;;  %v1297_v52 = vmul.f32 %v2912_v44, %v1265_v42  ;;  %v2136_v42 = vld [vmem:[%s2455_s4] sm:$0xff] }
  0xcf   : > { %v2116_v7 = vpop.eup %2115 }
  0xd0   : > { %1842 = vmatprep.subr.msk.mxu0 %vm868_vm10, %v2116_v7  ;;  %v1061_v18 = vmul.f32 %v2116_v7, %v217_v12  ;;  %v1295_v49 = vmul.f32 %v2116_v7, %v1263_v2  ;;  %v1281_v2 = vmul.f32 %v2957_v48, %v1249_v34  ;;  %v1377_v44 = vsel %vm868_vm10, %v1297_v52, 0.0 }
  0xd1   : > { %v1380_v48 = vsel %vm868_vm10, %v2929_v13, 0.0 }
  0xd2   : > { %1876 = vmatprep.subr.msk.mxu1 %vm868_vm10, %v1061_v18  ;;  %v1371_v50 = vsel %vm868_vm10, %v1295_v49, 0.0  ;;  %v1329_v3 = vsel %vm868_vm10, %v1281_v2, 0.0  ;;  %v2131_v49 = vld [vmem:[%s2455_s4 + $0xe8] sm:$0xff] }
  0xd3   : > { %v1270_v5 = vmul.f32 %v2131_v49, %v2131_v49 }
  0xd4   : > { %v2118_v61 = vpop.eup %2117 }
  0xd5   : > { %v1294_v16 = vmul.f32 %v2118_v61, %v1262_v62  ;;  %v1060_v12 = vmul.f32 %v2118_v61, %v216_v25  ;;  %v1280_v62 = vmul.f32 %v2114_v10, %v1248_v23  ;;  %v1302_v23 = vmul.f32 %v2522_v35, %v1270_v5  ;;  %v2137_v35 = vld [vmem:[%s2455_s4 + $0x70] sm:$0xff] }
  0xd6   : > { %v2120_v59 = vpop.eup %2119 }
  0xd7   : > { %v1368_v46 = vsel %vm868_vm10, %v1294_v16, 0.0  ;;  %v1278_v26 = vmul.f32 %v2120_v59, %v1246_v56  ;;  %v1044_v18 = vmul.f32 %v2120_v59, %v200_v1  ;;  %v1326_v10 = vsel %vm868_vm10, %v1280_v62, 0.0 }
  0xd8   : > { %1369 = vadd.xlane.f32.xlu1 %v1368_v46  ;;  %v1043_v1 = vmul.f32 %v3030_v58, %v3015_v33  ;;  %v2134_v46 = vld [vmem:[%s2455_s4 + $0x68] sm:$0xff]  ;;  %v1392_v34 = vsel %vm868_vm10, %v1302_v23, 0.0 }
  0xd9   : > { %v1320_v47 = vsel %vm868_vm10, %v1278_v26, 0.0  ;;  %v1254_v26 = vmul.f32 %v2134_v46, %v2134_v46 }
  0xda   : > { %1321 = vadd.xlane.f32.xlu0 %v1320_v47  ;;  %v1255_v47 = vmul.f32 %v2137_v35, %v2137_v35 }
  0xdb   : > { %v2122_v43 = vpop.eup %2121 }
  0xdc   : > { %1843 = vmatpush3.xpose.msk.msra.mxu0 %vm868_vm10, %v2122_v43  ;;  %v1045_v7 = vmul.f32 %v2122_v43, %v201_v37  ;;  %1372 = vadd.xlane.f32.xlu1 %v1371_v50  ;;  %v1279_v40 = vmul.f32 %v2122_v43, %v1247_v4  ;;  %v2135_v50 = vld [vmem:[%s2455_s4 + $0xf0] sm:$0xff]  ;;  %v2138_v43 = vld [vmem:[%s2455_s4 + $0xf8] sm:$0xff] }
  0xdd   : > { %1844 = vmatprep.subr.msk.mxu0 %vm868_vm10, %v2118_v61  ;;  %v1042_v61 = vmul.f32 %v2952_v6, %v2894_v53  ;;  %v1252_v53 = vmul.f32 %v2625_v36, %v2625_v36  ;;  %v1271_v21 = vmul.f32 %v2135_v50, %v2135_v50 }
  0xde   : > { %1877 = vmatpush3.xpose.msk.msra.mxu1 %vm868_vm10, %v1045_v7  ;;  %v1323_v25 = vsel %vm868_vm10, %v1279_v40, 0.0  ;;  %v1287_v40 = vmul.f32 %v2516_v32, %v1255_v47 }
  0xdf   : > { %1878 = vmatprep.subr.msk.mxu1 %vm868_vm10, %v1060_v12  ;;  %1324 = vadd.xlane.f32.xlu0 %v1323_v25  ;;  %v1272_v12 = vmul.f32 %v2138_v43, %v2138_v43  ;;  %v1303_v7 = vmul.f32 %v2495_v55, %v1271_v21 }
  0xe0   : > { %1845 = vmatpush3.xpose.msk.msra.mxu0 %vm868_vm10, %v2120_v59  ;;  %1375 = vadd.xlane.f32.xlu1 %v1374_v45  ;;  %v2132_v59 = vld [vmem:[%s2455_s4 + $0x8] sm:$0xff]  ;;  %v1347_v52 = vsel %vm868_vm10, %v1287_v40, 0.0 }
  0xe1   : > { %1846 = vmatprep.subr.msk.mxu0 %vm868_vm10, %v3021_v38  ;;  %v2127_v38 = vld [vmem:[%s2455_s4 + $0xd8] sm:$0xff]  ;;  %v1395_v45 = vsel %vm868_vm10, %v1303_v7, 0.0  ;;  %v1304_v55 = vmul.f32 %v2484_v29, %v1272_v12 }
  0xe2   : > { %1879 = vmatpush3.xpose.msk.msra.mxu1 %vm868_vm10, %v1044_v18  ;;  %v1268_v33 = vmul.f32 %v2127_v38, %v2127_v38 }
  0xe3   : > { %1880 = vmatprep.subr.msk.mxu1 %vm868_vm10, %v1059_v60  ;;  %1327 = vadd.xlane.f32.xlu0 %v1326_v10  ;;  %v1398_v18 = vsel %vm868_vm10, %v1304_v55, 0.0 }
  0xe4   : > { %1847 = vmatpush3.xpose.msk.msra.mxu0 %vm868_vm10, %v3030_v58  ;;  %1378 = vadd.xlane.f32.xlu1 %v1377_v44  ;;  %v1057_v58 = vmul.f32 %v2845_v28, %v2704_v17  ;;  %v1383_v17 = vsel %vm868_vm10, %v2940_v51, 0.0  ;;  %v1300_v13 = vmul.f32 %v2571_v24, %v1268_v33  ;;  %v1335_v24 = vsel %vm868_vm10, %v2950_v54, 0.0 }
  0xe5   : > { %1848 = vmatprep.subr.msk.mxu0 %vm868_vm10, %v2921_v39  ;;  %v1332_v39 = vsel %vm868_vm10, %v2935_v30, 0.0  ;;  %v2129_v30 = vld [vmem:[%s2455_s4 + $0x88] sm:$0xff] }
  0xe6   : > { %1881 = vmatpush3.xpose.msk.msra.mxu1 %vm868_vm10, %v1043_v1  ;;  %v1056_v36 = vmul.f32 %v2129_v30, %v2768_v63  ;;  %v1386_v16 = vsel %vm868_vm10, %v1300_v13, 0.0 }
  0xe7   : > { %1882 = vmatprep.subr.msk.mxu1 %vm868_vm10, %v2932_v0  ;;  %1330 = vadd.xlane.f32.xlu0 %v1329_v3  ;;  %v2128_v0 = vld [vmem:[%s2455_s4 + $0xe0] sm:$0xff] }
  0xe8   : > { %1849 = vmatpush3.xpose.msk.msra.mxu0 %vm868_vm10, %v2952_v6  ;;  %1381 = vadd.xlane.f32.xlu1 %v1380_v48  ;;  %v1269_v56 = vmul.f32 %v2128_v0, %v2128_v0  ;;  %v1041_v6 = vmul.f32 %v2851_v22, %v2718_v14  ;;  %v2130_v14 = vld [vmem:[%s2455_s4 + $0x60] sm:$0xff] }
  0xe9   : > { %1850 = vmatprep.subr.msk.mxu0 %vm868_vm10, %v2845_v28  ;;  %v1284_v28 = vmul.f32 %v2631_v27, %v1252_v53  ;;  %v1253_v51 = vmul.f32 %v2130_v14, %v2130_v14  ;;  %v2133_v27 = vld [vmem:[%s2455_s4 + $0x80] sm:$0xff] }
  0xea   : > { %1883 = vmatpush3.xpose.msk.msra.mxu1 %vm868_vm10, %v1042_v61  ;;  %v1301_v37 = vmul.f32 %v2547_v31, %v1269_v56  ;;  %v1055_v54 = vmul.f32 %v2133_v27, %v2592_v8 }
  0xeb   : > { %1884 = vmatprep.subr.msk.mxu1 %vm868_vm10, %v1057_v58  ;;  %1333 = vadd.xlane.f32.xlu0 %v1332_v39  ;;  %v1338_v31 = vsel %vm868_vm10, %v1284_v28, 0.0 }
  0xec   : > { %1851 = vmatpush3.xpose.msk.msra.mxu0 %vm868_vm10, %v2851_v22  ;;  %1384 = vadd.xlane.f32.xlu1 %v1383_v17  ;;  %v1040_v22 = vmul.f32 %v2132_v59, %v2782_v19  ;;  %v1389_v4 = vsel %vm868_vm10, %v1301_v37, 0.0 }
  0xed   : > { %1852 = vmatprep.subr.msk.mxu0 %vm868_vm10, %v2768_v63  ;;  %v1285_v63 = vmul.f32 %v2558_v11, %v1253_v51 }
  0xee   : > { %1885 = vmatpush3.xpose.msk.msra.mxu1 %vm868_vm10, %v1041_v6 }
  0xef   : > { %1886 = vmatprep.subr.msk.mxu1 %vm868_vm10, %v1056_v36  ;;  %1336 = vadd.xlane.f32.xlu0 %v1335_v24  ;;  %v1341_v11 = vsel %vm868_vm10, %v1285_v63, 0.0 }
  0xf0   : > { %1853 = vmatpush3.xpose.msk.msra.mxu0 %vm868_vm10, %v2782_v19  ;;  %1387 = vadd.xlane.f32.xlu1 %v1386_v16  ;;  %v1039_v19 = vmul.f32 %v2136_v42, %v2602_v41  ;;  %v1355_v60 = vpop.xlane.xlu1 %1354 }
  0xf1   : > { %1854 = vmatprep.subr.msk.mxu0 %vm868_vm10, %v2592_v8  ;;  %v1286_v8 = vmul.f32 %v2537_v57, %v1254_v26  ;;  %v2139_v57 = vld [vmem:[%s2455_s4 + $0x78] sm:$0xff]  ;;  %v1307_v25 = vpop.xlane.xlu0 %1306 }
  0xf2   : > { %1887 = vmatpush3.xpose.msk.msra.mxu1 %vm868_vm10, %v1040_v22  ;;  %v1256_v62 = vmul.f32 %v2139_v57, %v2139_v57 }
  0xf3   : > { %1888 = vmatprep.subr.msk.mxu1 %vm868_vm10, %v1055_v54  ;;  %1339 = vadd.xlane.f32.xlu0 %v1338_v31 }
  0xf4   : > { %1855 = vmatpush3.xpose.msk.msra.mxu0 %vm868_vm10, %v2602_v41  ;;  %1390 = vadd.xlane.f32.xlu1 %v1389_v4  ;;  %v1344_v41 = vsel %vm868_vm10, %v1286_v8, 0.0 }
  0xf6   : > { %1889 = vmatpush3.xpose.msk.msra.mxu1 %vm868_vm10, %v1039_v19 }
  0xf7   : > { %1857 = vmatmul.mubr.msk.f32.vlgmr.msra.gmra.mxu0 %vm868_vm10, %v3002_v20  ;;  %1342 = vadd.xlane.f32.xlu0 %v1341_v11  ;;  %v1288_v20 = vmul.f32 %v2490_v15, %v1256_v62  ;;  %v1437_v15 = vlaneseq }
  0xf8   : > { %1393 = vadd.xlane.f32.xlu1 %v1392_v34 }
  0xf9   : > { %1891 = vmatmul.mubr.msk.f32.vlgmr.msra.gmra.mxu1 %vm868_vm10, %v2682_v9  ;;  %v1350_v32 = vsel %vm868_vm10, %v1288_v20, 0.0  ;;  %v3166_v39 = vand.u32 127, %v1437_v15  ;;  %v3170_v17 = vshrl.u32 %v1437_v15, 7  ;;  %vm1448_vm10 = vcmask 130112  }
  0xfb   : > { %1345 = vadd.xlane.f32.xlu0 %v1344_v41  ;;  %v1443_v13 = vadd.s32 4294967288, %v3166_v39  ;;  %v1450_v56 = vadd.s32 4294967280, %v3166_v39  ;;  %v1441_v6 = vsub.s32 %v3166_v39, %v3170_v17  ;;  %v1457_v24 = vadd.s32 4294967272, %v3166_v39 }
  0xfc   : > { %1396 = vadd.xlane.f32.xlu1 %v1395_v45  ;;  %v1464_v37 = vadd.s32 4294967264, %v3166_v39  ;;  %v1471_v31 = vadd.s32 4294967256, %v3166_v39  ;;  %v1478_v21 = vadd.s32 4294967248, %v3166_v39  ;;  %v1485_v43 = vadd.s32 4294967240, %v3166_v39 }
  0xfd   : > { %v1446_v30 = vsub.s32 %v1443_v13, %v3170_v17  ;;  %v1453_v28 = vsub.s32 %v1450_v56, %v3170_v17  ;;  %v1442_v51 = vrot.slane %v1307_v25, %v1441_v6  ;;  %v1551_v49 = vrot.slane %v1355_v60, %v1441_v6 }
  0xfe   : > { %v1460_v59 = vsub.s32 %v1457_v24, %v3170_v17  ;;  %v1467_v46 = vsub.s32 %v1464_v37, %v3170_v17  ;;  %v1474_v19 = vsub.s32 %v1471_v31, %v3170_v17  ;;  %v1481_v34 = vsub.s32 %v1478_v21, %v3170_v17 }
  0xff   : > { %1348 = vadd.xlane.f32.xlu0 %v1347_v52  ;;  %v1492_v62 = vadd.s32 4294967232, %v3166_v39  ;;  %v1488_v55 = vsub.s32 %v1485_v43, %v3170_v17  ;;  %v1499_v25 = vadd.s32 4294967224, %v3166_v39 }
 0x100   : > { %1399 = vadd.xlane.f32.xlu1 %v1398_v18 }
 0x103   : > { %1351 = vadd.xlane.f32.xlu0 %v1350_v32 }
 0x114   : > { %v1358_v10 = vpop.xlane.xlu1 %1357 }
 0x115   : > { %v1555_v5 = vrot.slane %v1358_v10, %v1446_v30 }
 0x116   : > { %v1310_v9 = vpop.xlane.xlu0 %1309 }
 0x117   : > { %v1447_v16 = vrot.slane %v1310_v9, %v1446_v30  ;;  %v1556_v4 = vsel %vm1448_vm10, %v1555_v5, %v1551_v49  ;;  %v1495_v9 = vsub.s32 %v1492_v62, %v3170_v17 }
 0x119   : > { %v1449_v54 = vsel %vm1448_vm10, %v1447_v16, %v1442_v51 }
 0x11d   : > { %v1361_v44 = vpop.xlane.xlu1 %1360 }
 0x11e   : > { %v1313_v2 = vpop.xlane.xlu0 %1312  ;;  %v1560_v63 = vrot.slane %v1361_v44, %v1453_v28 }
 0x11f   : > { %v1454_v22 = vrot.slane %v1313_v2, %v1453_v28 }
 0x120   : > { %v1561_v11 = vsel %vm1455_vm2, %v1560_v63, %v1556_v4  ;;  %v1534_v63 = vadd.s32 4294967184, %v3166_v39 }
 0x121   : > { %v1456_v50 = vsel %vm1455_vm2, %v1454_v22, %v1449_v54 }
 0x133   : > { %v1364_v1 = vpop.xlane.xlu1 %1363 }
 0x134   : > { %v1565_v42 = vrot.slane %v1364_v1, %v1460_v59  ;;  %v1506_v1 = vadd.s32 4294967216, %v3166_v39 }
 0x136   : > { %v1566_v41 = vsel %vm1462_vm3, %v1565_v42, %v1561_v11  ;;  %v1541_v42 = vadd.s32 4294967176, %v3166_v39  ;;  %v1537_v11 = vsub.s32 %v1534_v63, %v3170_v17 }
 0x137   : > { %v1316_v29 = vpop.xlane.xlu0 %1315 }
 0x138   : > { %v1461_v23 = vrot.slane %v1316_v29, %v1460_v59 }
 0x13a   : > { %v1463_v47 = vsel %vm1462_vm3, %v1461_v23, %v1456_v50 }
 0x14b   : > { %v1367_v48 = vpop.xlane.xlu1 %1366 }
 0x14c   : > { %v1570_v12 = vrot.slane %v1367_v48, %v1467_v46  ;;  %v1502_v48 = vsub.s32 %v1499_v25, %v3170_v17 }
 0x14e   : > { %v1571_v52 = vsel %vm1469_vm4, %v1570_v12, %v1566_v41 }
 0x150   : > { %v1319_v3 = vpop.xlane.xlu0 %1318 }
 0x151   : > { %v1468_v8 = vrot.slane %v1319_v3, %v1467_v46 }
 0x153   : > { %v1470_v57 = vsel %vm1469_vm4, %v1468_v8, %v1463_v47 }
 0x161   : > { %v3160_v33 = vpop.xlane.xlu1 %1369 }
 0x162   : > { %v1575_v45 = vrot.slane %v3160_v33, %v1474_v19 }
 0x163   : > { %v1322_v38 = vpop.xlane.xlu0 %1321 }
 0x164   : > { %v1475_v40 = vrot.slane %v1322_v38, %v1474_v19  ;;  %v1576_v2 = vsel %vm1476_vm5, %v1575_v45, %v1571_v52 }
 0x165   : > { %v3164_v58 = vpop.xlane.xlu1 %1372 }
 0x166   : > { %v1477_v32 = vsel %vm1476_vm5, %v1475_v40, %v1470_v57  ;;  %v1580_v60 = vrot.slane %v3164_v58, %v1481_v34  ;;  %v1513_v58 = vadd.s32 4294967208, %v3166_v39 }
 0x168   : > { %v3162_v61 = vpop.xlane.xlu0 %1324  ;;  %v1581_v38 = vsel %vm1483_vm6, %v1580_v60, %v1576_v2 }
 0x169   : > { %v3173_v0 = vpop.xlane.xlu1 %1375  ;;  %v1482_v20 = vrot.slane %v3162_v61, %v1481_v34  ;;  %v1544_v34 = vsub.s32 %v1541_v42, %v3170_v17 }
 0x16a   : > { %v1585_v3 = vrot.slane %v3173_v0, %v1488_v55  ;;  %v1520_v0 = vadd.s32 4294967200, %v3166_v39 }
 0x16b   : > { %v1484_v29 = vsel %vm1483_vm6, %v1482_v20, %v1477_v32 }
 0x16c   : > { %v3168_v53 = vpop.xlane.xlu0 %1327  ;;  %v1586_v6 = vsel %vm1490_vm7, %v1585_v3, %v1581_v38  ;;  %v1523_v59 = vsub.s32 %v1520_v0, %v3170_v17 }
 0x16d   : > { %v3183_v14 = vpop.xlane.xlu1 %1378  ;;  %v1489_v44 = vrot.slane %v3168_v53, %v1488_v55  ;;  %v1509_v53 = vsub.s32 %v1506_v1, %v3170_v17 }
 0x16e   : > { %v1590_v13 = vrot.slane %v3183_v14, %v1495_v9  ;;  %v1527_v14 = vadd.s32 4294967192, %v3166_v39 }
 0x16f   : > { %v1491_v61 = vsel %vm1490_vm7, %v1489_v44, %v1484_v29 }
 0x170   : > { %v3179_v36 = vpop.xlane.xlu0 %1330  ;;  %v1591_v51 = vsel %vm1497_vm8, %v1590_v13, %v1586_v6 }
 0x171   : > { %v3191_v26 = vpop.xlane.xlu1 %1381  ;;  %v1496_v33 = vrot.slane %v3179_v36, %v1495_v9  ;;  %v1516_v36 = vsub.s32 %v1513_v58, %v3170_v17 }
 0x172   : > { %v1595_v28 = vrot.slane %v3191_v26, %v1502_v48  ;;  %v1530_v26 = vsub.s32 %v1527_v14, %v3170_v17 }
 0x173   : > { %v1498_v24 = vsel %vm1497_vm8, %v1496_v33, %v1491_v61 }
 0x174   : > { %v3187_v27 = vpop.xlane.xlu0 %1333 }
 0x175   : > { %v1385_v7 = vpop.xlane.xlu1 %1384  ;;  %v1503_v30 = vrot.slane %v3187_v27, %v1502_v48  ;;  %v1596_v27 = vsel %vm1504_vm9, %v1595_v28, %v1591_v51 }
 0x176   : > { %v1600_v5 = vrot.slane %v1385_v7, %v1509_v53 }
 0x177   : > { %v1505_v49 = vsel %vm1504_vm9, %v1503_v30, %v1498_v24 }
 0x178   : > { %v1337_v35 = vpop.xlane.xlu0 %1336  ;;  %v1601_v4 = vsel %vm1511_vm11, %v1600_v5, %v1596_v27 }
 0x179   : > { %v1388_v10 = vpop.xlane.xlu1 %1387  ;;  %v1510_v16 = vrot.slane %v1337_v35, %v1509_v53 }
 0x17a   : > { %v1605_v46 = vrot.slane %v1388_v10, %v1516_v36 }
 0x17b   : > { %v1512_v31 = vsel %vm1511_vm11, %v1510_v16, %v1505_v49 }
 0x17c   : > { %v1340_v18 = vpop.xlane.xlu0 %1339  ;;  %v1606_v35 = vsel %vm1518_vm12, %v1605_v46, %v1601_v4 }
 0x17d   : > { %v1391_v56 = vpop.xlane.xlu1 %1390  ;;  %v1517_v54 = vrot.slane %v1340_v18, %v1516_v36 }
 0x17e   : > { %v1610_v19 = vrot.slane %v1391_v56, %v1523_v59 }
 0x17f   : > { %v1519_v21 = vsel %vm1518_vm12, %v1517_v54, %v1512_v31 }
 0x180   : > { %v1343_v15 = vpop.xlane.xlu0 %1342  ;;  %v1611_v7 = vsel %vm1525_vm13, %v1610_v19, %v1606_v35 }
 0x181   : > { %v1394_v22 = vpop.xlane.xlu1 %1393  ;;  %v1524_v23 = vrot.slane %v1343_v15, %v1523_v59 }
 0x182   : > { %v1615_v12 = vrot.slane %v1394_v22, %v1530_v26 }
 0x183   : > { %v1526_v43 = vsel %vm1525_vm13, %v1524_v23, %v1519_v21 }
 0x184   : > { %v1346_v37 = vpop.xlane.xlu0 %1345  ;;  %v1616_v55 = vsel %vm1532_vm14, %v1615_v12, %v1611_v7 }
 0x185   : > { %v1397_v8 = vpop.xlane.xlu1 %1396  ;;  %v1531_v47 = vrot.slane %v1346_v37, %v1530_v26 }
 0x186   : > { %v1620_v62 = vrot.slane %v1397_v8, %v1537_v11 }
 0x187   : > { %v1533_v57 = vsel %vm1532_vm14, %v1531_v47, %v1526_v43 }
 0x188   : > { %v1349_v50 = vpop.xlane.xlu0 %1348  ;;  %v1621_v9 = vsel %vm1539_vm15, %v1620_v62, %v1616_v55 }
 0x189   : > { %v1538_v41 = vrot.slane %v1349_v50, %v1537_v11  ;;  %v1400_v45 = vpop.xlane.xlu1 %1399 }
 0x18a   : > { %v1625_v25 = vrot.slane %v1400_v45, %v1544_v34 }
 0x18b   : > { %v1540_v18 = vsel %vm1539_vm15, %v1538_v41, %v1533_v57 }
 0x18c   : > { %v1352_v40 = vpop.xlane.xlu0 %1351  ;;  %v1626_v3 = vsel %vm1546_vm0, %v1625_v25, %v1621_v9 }
 0x18d   : > { %v1545_v39 = vrot.slane %v1352_v40, %v1544_v34 }
 0x18f   : > { %v1547_v2 = vsel %vm1546_vm0, %v1545_v39, %v1540_v18 }
 0x1b7   : > { %v1034_v52 = vpop.f32.mrf.mxu0 }
 0x1b9   : > { %v1236_v20 = vpop.f32.mrf.mxu1  ;;  %v1036_v44 = vpop.f32.mrf.mxu0 }
 0x1ba   : > { %v1401_v32 = vmul.f32 2.0, %v1236_v20 }
 0x1bb   : > { %v1238_v60 = vpop.f32.mrf.mxu1 }
 0x1bc   : > { %v1403_v10 = vsub.f32 %v1034_v52, %v1401_v32  ;;  %v1402_v17 = vmul.f32 2.0, %v1238_v60 }
 0x1be   : > { %v1647_v29 = vadd.f32 %v1547_v2, %v1403_v10  ;;  %v1404_v1 = vsub.f32 %v1036_v44, %v1402_v17 }
 0x1c0   : > { %v1649_v48 = vsub.f32 0.0, %v1647_v29  ;;  %v1648_v38 = vadd.f32 %v1626_v3, %v1404_v1 }
 0x1c2   : > { %v1651_v33 = vmul.f32 1.442695, %v1649_v48  ;;  %v1650_v15 = vsub.f32 0.0, %v1648_v38 }
 0x1c4   : > { %2123 = vpow2.f32 %v1651_v33  ;;  %v1653_v61 = vmul.f32 1.442695, %v1650_v15 }
 0x1c6   : > { %2125 = vpow2.f32 %v1653_v61 }
 0x1d1   : > { %v2124_v58 = vpop.eup %2123 }
 0x1d2   : > { %1655 = vst [vmem:[%s180_s10] sm:$0xff] %v2124_v58 }
 0x1d3   : > { %v2126_v13 = vpop.eup %2125 }
 0x1d4   : > { %1656 = vst [vmem:[%s180_s10 + $0x8] sm:$0xff] %v2126_v13 }
 0x1d5   : > { %2153 = shalt.err (!%p2150_p3)
}
 0x1d6   : > { %s2154_s28 = scalar_lea.hbm %s3228_s20, 256  ;;  %s2158_s4 = scalar_lea.hbm %s3266_s3, 512 }
 0x1d7   : > { %p2155_p4 = scmp.ne.s32.totalorder %s3228_s20, %s2154_s28  ;;  %p2159_p9 = scmp.lt.s32.totalorder %s3228_s20, %s3266_s3 }
 0x1d8   : > { %p2160_p10 = scmp.lt.s32.totalorder %s2158_s4, %s2154_s28 }
 0x1d9   : > { %p2156_p7 = pnand %p2155_p4, %p2261_p5 }
 0x1da   : > { %p2161_p11 = por %p2160_p10, %p2159_p9 }
 0x1db   : > { %p2157_p8 = pneg %p2156_p7 }
 0x1dd   : > { %p2162_p12 = pnand %p2161_p11, %p2157_p8 }
 0x1df   : > { %2165 = shalt.err (!%p2162_p12)
}
 0x1e0   : > { %1892 = dma.vmem_to_hbm [thread:$0]  (%p2261_p5), %s1673_s11, 256, %s3228_s20, %s1658_s24  }
 0x1e1 PF: > { %p1898_p13 = scmp.ge.s32.totalorder %s2200_s15, 2  ;;  %s1684_s7 = sand.u32 1, %s2188_s12  }
 0x1e2   : > { %s1685_s8 = scalar_lea.sflag [#allocation3], %s1684_s7 }
 0x1e3   : > { %p1895_p0 = pnand %p1898_p13, %p2265_p6 }
 0x1e5   : > { %p1896_p1 = pneg %p1895_p0 }
 0x1e7   : > { %2183 = dma.done.wait (%p1896_p1), %s1685_s8, 256  }
 0x1e8   : > { %2185 = vsyncadd (%p1896_p1), %s1685_s8, 4294967040  ;;  %p13_p2 = scmp.ge.s32.totalorder %s2248_s18, 4   ;;  %s3329_s12 = smov %s2192_s13 }
 0x1e9   : > { %s3330_s13 = smov %s2196_s14  ;;  %s3331_s14 = smov %s2259_s21 }
 0x1ea   : > { %s3332_s15 = smov %s2248_s18  ;;  %15 = sbr.rel (!%p13_p2) target bundleno = 3 (0x3), region = 70 }
 0x1ef   :  { %1690 = vsyncpa [#allocation3], 1 }
 0x1f0   :  { %1692 = vsyncpa [#allocation3 + $0x1], 1 }

</bundles_post_ra>
